<compile_context>
chip_gen: v7x
topology: tpu7x:2x2x1
jax: 0.10.0
libtpu: 0.0.40
codegen_flags: <defaults>
</compile_context>

<pallas_src>
import functools

import jax
import jax.numpy as jnp
from jax import lax
from jax.experimental import pallas as pl
from jax.experimental.pallas import tpu as pltpu

EPS = 1e-5  # PyTorch GroupNorm default eps


def _fusion_kernel(x_ref, w_ref, gn_ref, gb_ref, o_ref, *scratch,
                   C, tn, inv_n, cache_x):
    if cache_x:
        xc_ref, sum_ref, sq_ref, scale_ref, shift_ref = scratch
    else:
        sum_ref, sq_ref, scale_ref, shift_ref = scratch
        xc_ref = None

    s = pl.program_id(0)          # phase: 0 = stats sweep, 1 = normalize + write
    n = pl.program_id(1)          # N-tile index
    nt = pl.num_programs(1)
    C2 = 2 * C

    @pl.when(s == 0)
    def _stats_phase():
        x = x_ref[...]                      # (2C, tn) input tile n
        if cache_x:
            xc_ref[n] = x                   # keep the tile resident for phase 1

        @pl.when(n == 0)
        def _init():
            sum_ref[...] = jnp.zeros_like(sum_ref)
            sq_ref[...] = jnp.zeros_like(sq_ref)

        # Stats are only needed for the two GroupNorm branches (top 2C rows of the
        # fused block-diagonal weight), and are bias-free (GN is shift-invariant).
        y = jnp.dot(w_ref[0:C2, :], x, preferred_element_type=jnp.float32)  # (2C, tn)

        # Lane-parallel accumulation: plain VPU adds per 128-lane sub-block each
        # tile; the single XLU lane-reduction is deferred to the finalize step.
        ps = y[:, 0:128]
        pq = y[:, 0:128] * y[:, 0:128]
        for i in range(1, tn // 128):
            blk = y[:, i * 128:(i + 1) * 128]
            ps = ps + blk
            pq = pq + blk * blk
        sum_ref[...] += ps
        sq_ref[...] += pq

        @pl.when(n == nt - 1)
        def _finalize():
            tot = jnp.sum(sum_ref[...], axis=-1, keepdims=True)    # (2C, 1)
            tot2 = jnp.sum(sq_ref[...], axis=-1, keepdims=True)
            mean = tot * inv_n
            var = tot2 * inv_n - mean * mean                       # E[y^2] - E[y]^2
            rstd = lax.rsqrt(var + EPS)
            gamma = gn_ref[:, 0:1]
            beta = gn_ref[:, 1:2]
            scale = rstd * gamma                  # folded GN affine:
            scale_ref[...] = scale                #   y_norm = y * scale + shift
            shift_ref[...] = beta - mean * scale

    @pl.when(s == 1)
    def _write_phase():
        if cache_x:
            x = xc_ref[n]                   # re-read from VMEM, not HBM
        else:
            x = x_ref[...]

        # Recompute the fused block-diagonal 1x1 conv (MXU has huge slack; this
        # avoids holding a (4C, N) intermediate in VMEM/HBM).
        y = jnp.dot(w_ref[...], x, preferred_element_type=jnp.float32)    # (4C, tn)

        scale = scale_ref[...]
        shift = shift_ref[...]
        inp_p = y[0:C] * scale[0:C] + shift[0:C]          # GroupNorm'd point branch
        inp_i = y[C:C2] * scale[C:C2] + shift[C:C2]       # GroupNorm'd image branch
        gate_p = jax.nn.sigmoid(y[C2:3 * C] + gb_ref[0:C])
        gate_i = jax.nn.sigmoid(y[3 * C:4 * C] + gb_ref[C:C2])

        fused = gate_p * inp_p + gate_i * inp_i
        denom = gate_p + gate_i
        # EUP approximate reciprocal + one Newton-Raphson step (~f32 accurate,
        # keeps the divide off the VALU-bound elementwise tail).
        r = pl.reciprocal(denom, approx=True)
        r = r * (2.0 - denom * r)

        o_ref[0] = x[0:C].astype(o_ref.dtype)        # passthrough: point feats
        o_ref[1] = x[C:C2].astype(o_ref.dtype)       # passthrough: image feats
        o_ref[2] = (fused * r).astype(o_ref.dtype)   # fused / (gate_p + gate_i)


def _pack_params(params, C):
    """Fold the 4 conv weights into one block-diagonal (4C, 2C) weight with the
    GroupNorm rows first, a (2C, 2) [gamma|beta] operand for the GN rows, and a
    (2C, 1) bias for the gate rows.  The conv bias of the GN branches is dropped
    (GroupNorm is invariant to a per-channel constant shift)."""
    zp = jnp.zeros((C, C), jnp.float32)
    w_block = jnp.concatenate([
        jnp.concatenate([params["wip"], zp], axis=1),   # inp_p  (acts on point rows)
        jnp.concatenate([zp, params["wii"]], axis=1),   # inp_i  (acts on image rows)
        jnp.concatenate([params["wgp"], zp], axis=1),   # gate_p
        jnp.concatenate([zp, params["wgi"]], axis=1),   # gate_i
    ], axis=0)                                          # (4C, 2C)

    gn_par = jnp.concatenate([
        jnp.concatenate([params["gip"], params["btp"]], axis=1),
        jnp.concatenate([params["gii"], params["bti"]], axis=1),
    ], axis=0).astype(jnp.float32)                      # (2C, 2) = [gamma | beta]

    gate_bias = jnp.concatenate([params["bgp"], params["bgi"]],
                                axis=0).astype(jnp.float32)   # (2C, 1)
    return w_block, gn_par, gate_bias


def _vmem_capacity_bytes():
    try:
        return int(pltpu.get_tpu_info().vmem_capacity_bytes)
    except Exception:
        return 64 * 1024 * 1024   # conservative: v7x per-TensorCore VMEM


def _pick_n_tile(n_padded, vmem_cap):
    # Larger tiles amortize the ~0.35us/grid-step overhead; cap lower on the
    # 64 MiB-VMEM generation (v7x) than on the 128 MiB parts (v5e/v6e).
    if vmem_cap >= 100 * 1024 * 1024:
        candidates = (8192, 4096, 2048, 1024, 512, 256, 128)
    else:
        candidates = (2048, 1024, 512, 256, 128)
    for cand in candidates:
        if n_padded % cand == 0:
            return cand
    return 128  # unreachable: n_padded is always a multiple of 128


def fusion_module_c(objs, params, n_tile=None):
    """objs: (1, 2*C, N) float32. Returns (3, C, N) == cat([p, im, fused/(gp+gi)])."""
    _, D, N = objs.shape
    C = D // 2
    x = objs.reshape(D, N)          # rows 0:C = point feats, rows C:2C = image feats

    # Pad N up to a lane multiple; padded zero columns contribute 0 to both sum and
    # sum-of-squares of W@x, so GroupNorm stats stay exact as long as inv_n = 1/N.
    n_pad = ((N + 127) // 128) * 128
    if n_pad != N:
        x = jnp.pad(x, ((0, 0), (0, n_pad - N)))

    vmem_cap = _vmem_capacity_bytes()
    tn = n_tile if n_tile is not None else _pick_n_tile(n_pad, vmem_cap)
    assert n_pad % tn == 0 and tn % 128 == 0, "N tile must divide padded N and be a 128-multiple"
    nt = n_pad // tn

    # Cache the streamed input in VMEM during phase 0 so phase 1 never re-reads it
    # from HBM (~28% of total traffic on this HBM-bound kernel).  Gate on a
    # conservative per-TC VMEM budget; fall back to the two-read scheme otherwise.
    cache_bytes = D * n_pad * 4
    cache_x = cache_bytes <= max(20 * 1024 * 1024, vmem_cap // 4)

    work_bytes = 4 * tn * (2 * D + 6 * C + 8 * C)       # dbl-buffered tiles + intermediates (rough)
    need = (cache_bytes if cache_x else 0) + work_bytes + D * 128 * 8 + (2 << 20)
    vmem_limit = int(min(max(2 * need, 32 * 1024 * 1024), int(0.9 * vmem_cap)))
    vmem_limit = max(vmem_limit, 16 * 1024 * 1024)

    w_block, gn_par, gate_bias = _pack_params(params, C)

    kernel = functools.partial(_fusion_kernel, C=C, tn=tn,
                               inv_n=1.0 / float(N), cache_x=cache_x)

    # With the x-cache, phase 1 pins the input block to 0 (one negligible re-fetch)
    # and reads its tiles from VMEM instead of HBM.
    x_index_map = (lambda s, n: (0, (1 - s) * n)) if cache_x else (lambda s, n: (0, n))

    scratch = []
    if cache_x:
        scratch.append(pltpu.VMEM((nt, D, tn), jnp.float32))    # x cache (whole input)
    scratch += [
        pltpu.VMEM((D, 128), jnp.float32),    # lane-parallel running sum (GN rows)
        pltpu.VMEM((D, 128), jnp.float32),    # lane-parallel running sum of squares
        pltpu.VMEM((D, 1), jnp.float32),      # folded GN scale = rstd * gamma
        pltpu.VMEM((D, 1), jnp.float32),      # folded GN shift = beta - mean * scale
    ]

    grid_spec = pltpu.PrefetchScalarGridSpec(
        num_scalar_prefetch=0,
        grid=(2, nt),                                       # (phase, N-tile)
        in_specs=[
            pl.BlockSpec((D, tn), x_index_map),             # streamed input tile
            pl.BlockSpec((4 * C, D), lambda s, n: (0, 0)),  # fused block-diag weight (resident)
            pl.BlockSpec((D, 2), lambda s, n: (0, 0)),      # [gamma | beta] for GN rows
            pl.BlockSpec((D, 1), lambda s, n: (0, 0)),      # gate conv bias
        ],
        # Pinned to block 0 during phase 0 (never written there); advances in
        # phase 1 only after the kernel writes the block -> each block flushed once.
        out_specs=pl.BlockSpec((3, C, tn), lambda s, n: (0, 0, s * n)),
        scratch_shapes=scratch,
    )

    out = pl.pallas_call(
        kernel,
        out_shape=jax.ShapeDtypeStruct((3, C, n_pad), jnp.float32),
        grid_spec=grid_spec,
        compiler_params=pltpu.CompilerParams(
            # Both axes carry a dependence through the stats / x-cache scratch.
            # TODO(synk): on v7x, split into a stats call + an apply call with a
            # "parallel" N axis so both TensorCores are used.
            dimension_semantics=("arbitrary", "arbitrary"),
            vmem_limit_bytes=vmem_limit,
        ),
    )(x, w_block, gn_par, gate_bias)

    return out[:, :, :N] if n_pad != N else out


def fusion_ref(objs, params):
    """Pure-JAX reference mirroring the PyTorch forward."""
    _, D, N = objs.shape
    C = D // 2
    feats = objs.reshape(2, C, N)
    p, im = feats[0], feats[1]

    gate_p = jax.nn.sigmoid(params["wgp"] @ p + params["bgp"])
    gate_i = jax.nn.sigmoid(params["wgi"] @ im + params["bgi"])

    def gn(x, g, b):
        m = x.mean(-1, keepdims=True)
        v = ((x - m) ** 2).mean(-1, keepdims=True)
        return (x - m) / jnp.sqrt(v + EPS) * g + b

    inp_p = gn(params["wip"] @ p + params["bip"], params["gip"], params["btp"])
    inp_i = gn(params["wii"] @ im + params["bii"], params["gii"], params["bti"])
    fused = gate_p * inp_p + gate_i * inp_i
    return jnp.stack([p, im, fused / (gate_p + gate_i)], axis=0)


def make_params(key, C):
    """Deterministic synthetic parameters (shapes from the module's __init__)."""
    ks = jax.random.split(key, 12)
    s = 1.0 / jnp.sqrt(C)

    def w(k):  # Conv1d weight (Cout, Cin, 1) -> (Cout, Cin)
        return jax.random.uniform(k, (C, C), jnp.float32, -s, s)

    def b(k):  # Conv1d bias (Cout,) -> (Cout, 1) for broadcasting over N
        return jax.random.uniform(k, (C, 1), jnp.float32, -s, s)

    return {
        "wgp": w(ks[0]), "bgp": b(ks[1]),
        "wgi": w(ks[2]), "bgi": b(ks[3]),
        "wip": w(ks[4]), "bip": b(ks[5]),
        "gip": 1.0 + 0.1 * jax.random.normal(ks[6], (C, 1), jnp.float32),
        "btp": 0.1 * jax.random.normal(ks[7], (C, 1), jnp.float32),
        "wii": w(ks[8]), "bii": b(ks[9]),
        "gii": 1.0 + 0.1 * jax.random.normal(ks[10], (C, 1), jnp.float32),
        "bti": 0.1 * jax.random.normal(ks[11], (C, 1), jnp.float32),
    }


if __name__ == "__main__":
    # appear_len == point_len == out_channels == C (required by the elementwise
    # gating in the reference module).
    C, N = 32, 512
    key = jax.random.PRNGKey(0)
    k_obj, k_par, k_obj2 = jax.random.split(key, 3)

    objs = jax.random.normal(k_obj, (1, 2 * C, N), dtype=jnp.float32)
    params = make_params(k_par, C)

    # n_tile=128 so the small demo exercises the multi-tile stats + write phases
    # and the VMEM x-cache path.
    out = jax.block_until_ready(fusion_module_c(objs, params, n_tile=128))
    ref = fusion_ref(objs, params)
    assert out.shape == (3, C, N)
    assert jnp.allclose(out, ref, atol=1e-4, rtol=1e-4), "mismatch vs JAX reference"

    # Ragged N exercises the pad-to-128 + slice path (single-tile grid).
    objs2 = jax.random.normal(k_obj2, (1, 2 * C, 200), dtype=jnp.float32)
    out2 = jax.block_until_ready(fusion_module_c(objs2, params))
    ref2 = fusion_ref(objs2, params)
    assert out2.shape == (3, C, 200)
    assert jnp.allclose(out2, ref2, atol=1e-4, rtol=1e-4), "mismatch vs JAX reference (ragged N)"

    print("KERNEL_OK")
</pallas_src>

<mosaic_0001>
module attributes {stable_mosaic.version = 11 : i64} {
  func.func @_fusion_kernel(%arg0: i32, %arg1: i32, %arg2: memref<64x128xf32, #tpu.memory_space<vmem>>, %arg3: memref<128x64xf32, #tpu.memory_space<vmem>>, %arg4: memref<64x2xf32, #tpu.memory_space<vmem>>, %arg5: memref<64x1xf32, #tpu.memory_space<vmem>>, %arg6: memref<3x32x128xf32, #tpu.memory_space<vmem>>, %arg7: memref<4x64x128xf32, #tpu.memory_space<vmem>>, %arg8: memref<64x128xf32, #tpu.memory_space<vmem>>, %arg9: memref<64x128xf32, #tpu.memory_space<vmem>>, %arg10: memref<64x1xf32, #tpu.memory_space<vmem>>, %arg11: memref<64x1xf32, #tpu.memory_space<vmem>>) attributes {dimension_semantics = [#tpu.dimension_semantics<arbitrary>, #tpu.dimension_semantics<arbitrary>], iteration_bounds = array<i64: 2, 4>, scalar_prefetch = 0 : i64, scratch_operands = 5 : i64, tpu.core_type = #tpu.core_type<tc>, window_params = [{transform_indices = @transform_0, window_bounds = array<i64: 64, 128>}, {pipeline_mode = #tpu.pipeline_mode<synchronous>, transform_indices = @transform_1, window_bounds = array<i64: 128, 64>}, {pipeline_mode = #tpu.pipeline_mode<synchronous>, transform_indices = @transform_2, window_bounds = array<i64: 64, 2>}, {pipeline_mode = #tpu.pipeline_mode<synchronous>, transform_indices = @transform_3, window_bounds = array<i64: 64, 1>}, {transform_indices = @transform_4, window_bounds = array<i64: 3, 32, 128>}]} {
    %c0_i32 = arith.constant 0 : i32
    %0 = arith.cmpi eq, %arg0, %c0_i32 : i32
    %1 = arith.extui %0 : i1 to i32
    %c0_i32_0 = arith.constant 0 : i32
    %2 = arith.cmpi ne, %1, %c0_i32_0 : i32
    scf.if %2 {
      %c0 = arith.constant 0 : index
      %c0_2 = arith.constant 0 : index
      %6 = vector.load %arg2[%c0, %c0_2] : memref<64x128xf32, #tpu.memory_space<vmem>>, vector<64x128xf32>
      %7 = arith.index_cast %arg1 : i32 to index
      %c0_3 = arith.constant 0 : index
      %c0_4 = arith.constant 0 : index
      %8 = vector.load %arg7[%7, %c0_3, %c0_4] : memref<4x64x128xf32, #tpu.memory_space<vmem>>, vector<1x64x128xf32>
      %9 = vector.shape_cast %8 : vector<1x64x128xf32> to vector<64x128xf32>
      %10 = vector.shape_cast %6 : vector<64x128xf32> to vector<1x64x128xf32>
      tpu.vector_store %arg7[%7, %c0_3, %c0_4], %10 {strides = array<i32>} : memref<4x64x128xf32, #tpu.memory_space<vmem>>, vector<1x64x128xf32>,
      %c0_i32_5 = arith.constant 0 : i32
      %11 = arith.cmpi eq, %arg1, %c0_i32_5 : i32
      %12 = arith.extui %11 : i1 to i32
      %c0_i32_6 = arith.constant 0 : i32
      %13 = arith.cmpi ne, %12, %c0_i32_6 : i32
      scf.if %13 {
        %cst_18 = arith.constant 0.000000e+00 : f32
        %26 = vector.broadcast %cst_18 : f32 to vector<64x128xf32>
        %c0_19 = arith.constant 0 : index
        %c0_20 = arith.constant 0 : index
        %27 = vector.load %arg8[%c0_19, %c0_20] : memref<64x128xf32, #tpu.memory_space<vmem>>, vector<64x128xf32>
        tpu.vector_store %arg8[%c0_19, %c0_20], %26 {strides = array<i32>} : memref<64x128xf32, #tpu.memory_space<vmem>>, vector<64x128xf32>,
        %cst_21 = arith.constant 0.000000e+00 : f32
        %28 = vector.broadcast %cst_21 : f32 to vector<64x128xf32>
        %c0_22 = arith.constant 0 : index
        %c0_23 = arith.constant 0 : index
        %29 = vector.load %arg9[%c0_22, %c0_23] : memref<64x128xf32, #tpu.memory_space<vmem>>, vector<64x128xf32>
        tpu.vector_store %arg9[%c0_22, %c0_23], %28 {strides = array<i32>} : memref<64x128xf32, #tpu.memory_space<vmem>>, vector<64x128xf32>,
      } else {
      }
      %c0_7 = arith.constant 0 : index
      %c0_8 = arith.constant 0 : index
      %14 = vector.load %arg3[%c0_7, %c0_8] : memref<128x64xf32, #tpu.memory_space<vmem>>, vector<64x64xf32>
      %cst = arith.constant dense<0.000000e+00> : vector<64x128xf32>
      %15 = tpu.matmul %14, %6, %cst {dimension_numbers = #tpu.dot_dimension_numbers<[1], [0], [0], [1], [0, 0, 1, 1], [], []>} : vector<64x64xf32>, vector<64x128xf32>, vector<64x128xf32> -> vector<64x128xf32>
      %16 = arith.mulf %15, %15 : vector<64x128xf32>
      %c0_9 = arith.constant 0 : index
      %c0_10 = arith.constant 0 : index
      %17 = vector.load %arg8[%c0_9, %c0_10] : memref<64x128xf32, #tpu.memory_space<vmem>>, vector<64x128xf32>
      %18 = arith.addf %17, %15 : vector<64x128xf32>
      %c0_11 = arith.constant 0 : index
      %c0_12 = arith.constant 0 : index
      %19 = vector.load %arg8[%c0_11, %c0_12] : memref<64x128xf32, #tpu.memory_space<vmem>>, vector<64x128xf32>
      tpu.vector_store %arg8[%c0_11, %c0_12], %18 {strides = array<i32>} : memref<64x128xf32, #tpu.memory_space<vmem>>, vector<64x128xf32>,
      %c0_13 = arith.constant 0 : index
      %c0_14 = arith.constant 0 : index
      %20 = vector.load %arg9[%c0_13, %c0_14] : memref<64x128xf32, #tpu.memory_space<vmem>>, vector<64x128xf32>
      %21 = arith.addf %20, %16 : vector<64x128xf32>
      %c0_15 = arith.constant 0 : index
      %c0_16 = arith.constant 0 : index
      %22 = vector.load %arg9[%c0_15, %c0_16] : memref<64x128xf32, #tpu.memory_space<vmem>>, vector<64x128xf32>
      tpu.vector_store %arg9[%c0_15, %c0_16], %21 {strides = array<i32>} : memref<64x128xf32, #tpu.memory_space<vmem>>, vector<64x128xf32>,
      %c3_i32 = arith.constant 3 : i32
      %23 = arith.cmpi eq, %arg1, %c3_i32 : i32
      %24 = arith.extui %23 : i1 to i32
      %c0_i32_17 = arith.constant 0 : i32
      %25 = arith.cmpi ne, %24, %c0_i32_17 : i32
      scf.if %25 {
        %c0_18 = arith.constant 0 : index
        %c0_19 = arith.constant 0 : index
        %26 = vector.load %arg8[%c0_18, %c0_19] : memref<64x128xf32, #tpu.memory_space<vmem>>, vector<64x128xf32>
        %cst_20 = arith.constant dense<0.000000e+00> : vector<64xf32>
        %27 = vector.multi_reduction <add>, %26, %cst_20 [1] : vector<64x128xf32> to vector<64xf32>
        %28 = vector.shape_cast %27 : vector<64xf32> to vector<64x1xf32>
        %c0_21 = arith.constant 0 : index
        %c0_22 = arith.constant 0 : index
        %29 = vector.load %arg9[%c0_21, %c0_22] : memref<64x128xf32, #tpu.memory_space<vmem>>, vector<64x128xf32>
        %cst_23 = arith.constant dense<0.000000e+00> : vector<64xf32>
        %30 = vector.multi_reduction <add>, %29, %cst_23 [1] : vector<64x128xf32> to vector<64xf32>
        %31 = vector.shape_cast %30 : vector<64xf32> to vector<64x1xf32>
        %cst_24 = arith.constant 0.001953125 : f32
        %32 = vector.broadcast %cst_24 : f32 to vector<64x1xf32>
        %33 = arith.mulf %28, %32 : vector<64x1xf32>
        %cst_25 = arith.constant 0.001953125 : f32
        %34 = vector.broadcast %cst_25 : f32 to vector<64x1xf32>
        %35 = arith.mulf %31, %34 : vector<64x1xf32>
        %36 = arith.mulf %33, %33 : vector<64x1xf32>
        %37 = arith.subf %35, %36 : vector<64x1xf32>
        %cst_26 = arith.constant 9.99999974E-6 : f32
        %38 = vector.broadcast %cst_26 : f32 to vector<64x1xf32>
        %39 = arith.addf %37, %38 : vector<64x1xf32>
        %40 = math.rsqrt %39 : vector<64x1xf32>
        %c0_27 = arith.constant 0 : index
        %c0_28 = arith.constant 0 : index
        %41 = vector.load %arg4[%c0_27, %c0_28] : memref<64x2xf32, #tpu.memory_space<vmem>>, vector<64x1xf32>
        %c0_29 = arith.constant 0 : index
        %c1 = arith.constant 1 : index
        %42 = vector.load %arg4[%c0_29, %c1] : memref<64x2xf32, #tpu.memory_space<vmem>>, vector<64x1xf32>
        %43 = arith.mulf %40, %41 : vector<64x1xf32>
        %c0_30 = arith.constant 0 : index
        %c0_31 = arith.constant 0 : index
        %44 = vector.load %arg10[%c0_30, %c0_31] : memref<64x1xf32, #tpu.memory_space<vmem>>, vector<64x1xf32>
        tpu.vector_store %arg10[%c0_30, %c0_31], %43 {strides = array<i32>} : memref<64x1xf32, #tpu.memory_space<vmem>>, vector<64x1xf32>,
        %45 = arith.mulf %33, %43 : vector<64x1xf32>
        %46 = arith.subf %42, %45 : vector<64x1xf32>
        %c0_32 = arith.constant 0 : index
        %c0_33 = arith.constant 0 : index
        %47 = vector.load %arg11[%c0_32, %c0_33] : memref<64x1xf32, #tpu.memory_space<vmem>>, vector<64x1xf32>
        tpu.vector_store %arg11[%c0_32, %c0_33], %46 {strides = array<i32>} : memref<64x1xf32, #tpu.memory_space<vmem>>, vector<64x1xf32>,
      } else {
      }
    } else {
    }
    %c1_i32 = arith.constant 1 : i32
    %3 = arith.cmpi eq, %arg0, %c1_i32 : i32
    %4 = arith.extui %3 : i1 to i32
    %c0_i32_1 = arith.constant 0 : i32
    %5 = arith.cmpi ne, %4, %c0_i32_1 : i32
    scf.if %5 {
      %6 = arith.index_cast %arg1 : i32 to index
      %c0 = arith.constant 0 : index
      %c0_2 = arith.constant 0 : index
      %7 = vector.load %arg7[%6, %c0, %c0_2] : memref<4x64x128xf32, #tpu.memory_space<vmem>>, vector<1x64x128xf32>
      %8 = vector.shape_cast %7 : vector<1x64x128xf32> to vector<64x128xf32>
      %c0_3 = arith.constant 0 : index
      %c0_4 = arith.constant 0 : index
      %9 = vector.load %arg3[%c0_3, %c0_4] : memref<128x64xf32, #tpu.memory_space<vmem>>, vector<128x64xf32>
      %cst = arith.constant dense<0.000000e+00> : vector<128x128xf32>
      %10 = tpu.matmul %9, %8, %cst {dimension_numbers = #tpu.dot_dimension_numbers<[1], [0], [0], [1], [0, 0, 1, 1], [], []>} : vector<128x64xf32>, vector<64x128xf32>, vector<128x128xf32> -> vector<128x128xf32>
      %c0_5 = arith.constant 0 : index
      %c0_6 = arith.constant 0 : index
      %11 = vector.load %arg10[%c0_5, %c0_6] : memref<64x1xf32, #tpu.memory_space<vmem>>, vector<64x1xf32>
      %c0_7 = arith.constant 0 : index
      %c0_8 = arith.constant 0 : index
      %12 = vector.load %arg11[%c0_7, %c0_8] : memref<64x1xf32, #tpu.memory_space<vmem>>, vector<64x1xf32>
      %13 = vector.extract_strided_slice %10 {offsets = [0, 0], sizes = [32, 128], strides = [1, 1]} : vector<128x128xf32> to vector<32x128xf32>
      %14 = vector.extract_strided_slice %11 {offsets = [0, 0], sizes = [32, 1], strides = [1, 1]} : vector<64x1xf32> to vector<32x1xf32>
      %15 = vector.broadcast %14 : vector<32x1xf32> to vector<32x128xf32>
      %16 = arith.mulf %13, %15 : vector<32x128xf32>
      %17 = vector.extract_strided_slice %12 {offsets = [0, 0], sizes = [32, 1], strides = [1, 1]} : vector<64x1xf32> to vector<32x1xf32>
      %18 = vector.broadcast %17 : vector<32x1xf32> to vector<32x128xf32>
      %19 = arith.addf %16, %18 : vector<32x128xf32>
      %20 = vector.extract_strided_slice %10 {offsets = [32, 0], sizes = [32, 128], strides = [1, 1]} : vector<128x128xf32> to vector<32x128xf32>
      %21 = vector.extract_strided_slice %11 {offsets = [32, 0], sizes = [32, 1], strides = [1, 1]} : vector<64x1xf32> to vector<32x1xf32>
      %22 = vector.broadcast %21 : vector<32x1xf32> to vector<32x128xf32>
      %23 = arith.mulf %20, %22 : vector<32x128xf32>
      %24 = vector.extract_strided_slice %12 {offsets = [32, 0], sizes = [32, 1], strides = [1, 1]} : vector<64x1xf32> to vector<32x1xf32>
      %25 = vector.broadcast %24 : vector<32x1xf32> to vector<32x128xf32>
      %26 = arith.addf %23, %25 : vector<32x128xf32>
      %27 = vector.extract_strided_slice %10 {offsets = [64, 0], sizes = [32, 128], strides = [1, 1]} : vector<128x128xf32> to vector<32x128xf32>
      %c0_9 = arith.constant 0 : index
      %c0_10 = arith.constant 0 : index
      %28 = vector.load %arg5[%c0_9, %c0_10] : memref<64x1xf32, #tpu.memory_space<vmem>>, vector<32x1xf32>
      %29 = vector.broadcast %28 : vector<32x1xf32> to vector<32x128xf32>
      %30 = arith.addf %27, %29 : vector<32x128xf32>
      %31 = arith.negf %30 : vector<32x128xf32>
      %32 = math.exp %31 : vector<32x128xf32>
      %cst_11 = arith.constant 1.000000e+00 : f32
      %33 = vector.broadcast %cst_11 : f32 to vector<32x128xf32>
      %34 = arith.addf %33, %32 : vector<32x128xf32>
      %35 = arith.divf %33, %34 : vector<32x128xf32>
      %36 = vector.extract_strided_slice %10 {offsets = [96, 0], sizes = [32, 128], strides = [1, 1]} : vector<128x128xf32> to vector<32x128xf32>
      %c32 = arith.constant 32 : index
      %c0_12 = arith.constant 0 : index
      %37 = vector.load %arg5[%c32, %c0_12] : memref<64x1xf32, #tpu.memory_space<vmem>>, vector<32x1xf32>
      %38 = vector.broadcast %37 : vector<32x1xf32> to vector<32x128xf32>
      %39 = arith.addf %36, %38 : vector<32x128xf32>
      %40 = arith.negf %39 : vector<32x128xf32>
      %41 = math.exp %40 : vector<32x128xf32>
      %cst_13 = arith.constant 1.000000e+00 : f32
      %42 = vector.broadcast %cst_13 : f32 to vector<32x128xf32>
      %43 = arith.addf %42, %41 : vector<32x128xf32>
      %44 = arith.divf %42, %43 : vector<32x128xf32>
      %45 = arith.mulf %35, %19 : vector<32x128xf32>
      %46 = arith.mulf %44, %26 : vector<32x128xf32>
      %47 = arith.addf %45, %46 : vector<32x128xf32>
      %48 = arith.addf %35, %44 : vector<32x128xf32>
      %49 = tpu.reciprocal %48 {approx = true} : vector<32x128xf32> -> vector<32x128xf32>
      %50 = arith.mulf %48, %49 : vector<32x128xf32>
      %cst_14 = arith.constant 2.000000e+00 : f32
      %51 = vector.broadcast %cst_14 : f32 to vector<32x128xf32>
      %52 = arith.subf %51, %50 : vector<32x128xf32>
      %53 = arith.mulf %49, %52 : vector<32x128xf32>
      %54 = vector.extract_strided_slice %8 {offsets = [0, 0], sizes = [32, 128], strides = [1, 1]} : vector<64x128xf32> to vector<32x128xf32>
      %c0_15 = arith.constant 0 : index
      %c0_16 = arith.constant 0 : index
      %c0_17 = arith.constant 0 : index
      %55 = vector.load %arg6[%c0_15, %c0_16, %c0_17] : memref<3x32x128xf32, #tpu.memory_space<vmem>>, vector<1x32x128xf32>
      %56 = vector.shape_cast %55 : vector<1x32x128xf32> to vector<32x128xf32>
      %57 = vector.shape_cast %54 : vector<32x128xf32> to vector<1x32x128xf32>
      tpu.vector_store %arg6[%c0_15, %c0_16, %c0_17], %57 {strides = array<i32>} : memref<3x32x128xf32, #tpu.memory_space<vmem>>, vector<1x32x128xf32>,
      %58 = vector.extract_strided_slice %8 {offsets = [32, 0], sizes = [32, 128], strides = [1, 1]} : vector<64x128xf32> to vector<32x128xf32>
      %c1 = arith.constant 1 : index
      %c0_18 = arith.constant 0 : index
      %c0_19 = arith.constant 0 : index
      %59 = vector.load %arg6[%c1, %c0_18, %c0_19] : memref<3x32x128xf32, #tpu.memory_space<vmem>>, vector<1x32x128xf32>
      %60 = vector.shape_cast %59 : vector<1x32x128xf32> to vector<32x128xf32>
      %61 = vector.shape_cast %58 : vector<32x128xf32> to vector<1x32x128xf32>
      tpu.vector_store %arg6[%c1, %c0_18, %c0_19], %61 {strides = array<i32>} : memref<3x32x128xf32, #tpu.memory_space<vmem>>, vector<1x32x128xf32>,
      %62 = arith.mulf %47, %53 : vector<32x128xf32>
      %c2 = arith.constant 2 : index
      %c0_20 = arith.constant 0 : index
      %c0_21 = arith.constant 0 : index
      %63 = vector.load %arg6[%c2, %c0_20, %c0_21] : memref<3x32x128xf32, #tpu.memory_space<vmem>>, vector<1x32x128xf32>
      %64 = vector.shape_cast %63 : vector<1x32x128xf32> to vector<32x128xf32>
      %65 = vector.shape_cast %62 : vector<32x128xf32> to vector<1x32x128xf32>
      tpu.vector_store %arg6[%c2, %c0_20, %c0_21], %65 {strides = array<i32>} : memref<3x32x128xf32, #tpu.memory_space<vmem>>, vector<1x32x128xf32>,
    } else {
    }
    return
  }
  func.func @transform_0(%arg0: i32, %arg1: i32) -> (i32, i32) {
    %c1_i32 = arith.constant 1 : i32
    %0 = arith.subi %c1_i32, %arg0 : i32
    %1 = arith.muli %0, %arg1 : i32
    %c0_i32 = arith.constant 0 : i32
    %c0_i32_0 = arith.constant 0 : i32
    return %c0_i32, %1 : i32, i32
  }
  func.func @transform_1(%arg0: i32, %arg1: i32) -> (i32, i32) {
    %c0_i32 = arith.constant 0 : i32
    %c0_i32_0 = arith.constant 0 : i32
    %c0_i32_1 = arith.constant 0 : i32
    return %c0_i32, %c0_i32_0 : i32, i32
  }
  func.func @transform_2(%arg0: i32, %arg1: i32) -> (i32, i32) {
    %c0_i32 = arith.constant 0 : i32
    %c0_i32_0 = arith.constant 0 : i32
    %c0_i32_1 = arith.constant 0 : i32
    return %c0_i32, %c0_i32_0 : i32, i32
  }
  func.func @transform_3(%arg0: i32, %arg1: i32) -> (i32, i32) {
    %c0_i32 = arith.constant 0 : i32
    %c0_i32_0 = arith.constant 0 : i32
    %c0_i32_1 = arith.constant 0 : i32
    return %c0_i32, %c0_i32_0 : i32, i32
  }
  func.func @transform_4(%arg0: i32, %arg1: i32) -> (i32, i32, i32) {
    %0 = arith.muli %arg0, %arg1 : i32
    %c0_i32 = arith.constant 0 : i32
    %c0_i32_0 = arith.constant 0 : i32
    %c0_i32_1 = arith.constant 0 : i32
    return %c0_i32, %c0_i32_0, %0 : i32, i32, i32
  }
}

</mosaic_0001>

<bundles_post_ra>
// kernel: tpu_custom_call.1
= control target key start
LH: loop header
LB: loop body
LE: loop exit
PB: predicated region body
PF: predicated region fallthrough
CT: control target
= control target key end

     0   :  { %9 = vsyncpa [#allocation9], 0  ;;  %s2258_s0 = inlined_call_operand.vmem [shape: f32[64,512], index: 0, kind: input, shape index: {}]   ;;  %s2259_s1 = inlined_call_operand.vmem [shape: f32[128,64], index: 1, kind: input, shape index: {}]   ;;  %s2260_s2 = inlined_call_operand.vmem [shape: f32[64,2], index: 2, kind: input, shape index: {}]   ;;  %s2261_s3 = inlined_call_operand.vmem [shape: f32[64,1], index: 3, kind: input, shape index: {}]   ;;  %s2262_s4 = inlined_call_operand.hbm [shape: f32[3,32,512], index: 4, kind: output, shape index: {}]  }
   0x1   :  { %11 = vsyncpa [#allocation9 + $0x1], 0  ;;  %s1828_s15 = smov 0   ;;  %s1830_s16 = smov 0  }
   0x2   :  { %s1832_s17 = smov 0   ;;  %s1834_s18 = smov 0  }
   0x3   :  { %s1836_s19 = smov 0   ;;  %s1838_s20 = smov 0  }
   0x4   :  { %s1840_s21 = smov 0   ;;  %s1842_s22 = smov 0  }
   0x5   :  { %s1844_s23 = smov 0   ;;  %s1846_s24 = smov 0  }
   0x6 LB: > { %2266 = sst [smem:[#allocation11_spill]] %s1785_s22  ;;  %s1317_s25 = sadd.s32 4294967295, %s1793_s24   ;;  %s1793_s24 = sphi %s1846_s24, %s17_s24   ;;  %s1789_s23 = sphi %s1844_s23, %s2280_s23   ;;  %s1785_s22 = sphi %s1842_s22, %s2279_s22   ;;  %s1781_s21 = sphi %s1840_s21, %s2273_s21   ;;  %s1777_s20 = sphi %s1838_s20, %s2272_s20   ;;  %s1773_s19 = sphi %s1836_s19, %s2278_s19   ;;  %s1769_s18 = sphi %s1834_s18, %s2277_s18   ;;  %s1765_s17 = sphi %s1832_s17, %s2276_s17   ;;  %s1761_s16 = sphi %s1830_s16, %s2275_s16   ;;  %s1757_s15 = sphi %s1828_s15, %s2274_s15  }
   0x7   : > { %2267 = sst [smem:[#allocation12_spill]] %s1789_s23  ;;  %s1318_s26 = sadd.s32 4294967294, %s1793_s24  }
   0x8   : > { %s26_s27 = sadd.s32 1, %s1785_s22  ;;  %s29_s28 = sadd.s32 1, %s1789_s23 }
   0x9   : > { %p27_p0 = scmp.ge.s32.totalorder %s26_s27, 4  ;;  %s33_s29 = ssub.s32 1, %s1789_s23 }
   0xa   : > { %s1884_s30 = smul.u32 %s1785_s22, %s33_s29  ;;  %s40_s5 = sadd.s32 1, %s1773_s19 }
   0xb   : > { %s2282_s27 = smov (%p27_p0, %s26_s27), 0  ;;  %s2284_s28 = smov (!%p27_p0, %s29_s28), %s1789_s23 }
   0xc   : > { %p47_p1 = scmp.ne.s32.totalorder %s1773_s19, %s1769_s18  ;;  %p48_p2 = scmp.eq.s32.totalorder %s1793_s24, 0 }
   0xd   : > { %p31_p3 = scmp.ge.s32.totalorder %s2284_s28, 2  ;;  %s126_s6 = smul.u32 %s1785_s22, %s1789_s23 }
   0xe   : > { %p1895_p4 = por %p48_p2, %p47_p1  ;;  %s131_s8 = sadd.s32 1, %s1765_s17 }
   0xf   : > { %s2286_s28 = smov (%p31_p3, %s2284_s28), 0  ;;  %p141_p5 = scmp.ne.s32.totalorder %s1765_s17, %s1761_s16 }
  0x10   : > { %p142_p6 = scmp.eq.s32.totalorder %s1317_s25, 7  ;;  %s35_s9 = ssub.s32 1, %s2286_s28 }
  0x11   : > { %s127_s10 = smul.u32 %s2286_s28, %s2282_s27  ;;  %p147_p8 = scmp.ne.s32.totalorder %s1761_s16, %s1757_s15 }
  0x12   : > { %s36_s11 = smul.u32 %s35_s9, %s2282_s27  ;;  %p1908_p7 = por %p142_p6, %p141_p5 }
  0x13   : > { %s128_s13 = ssub.s32 %s126_s6, %s127_s10  ;;  %p148_p11 = scmp.eq.s32.totalorder %s1318_s26, 7 }
  0x14   : > { %s37_s14 = ssub.s32 %s1884_s30, %s36_s11  ;;  %p129_p9 = scmp.eq.s32.totalorder %s128_s13, 0 }
  0x15   : > { %p38_p10 = scmp.eq.s32.totalorder %s37_s14, 0  ;;  %p1921_p12 = por %p148_p11, %p147_p8 }
  0x16   : > { %s1916_s29 = scalar_select %p129_p9, %s1765_s17, %s131_s8  }
  0x17   : > { %s1919_s23 = scalar_select %p38_p10, %s1773_s19, %s40_s5  }
  0x18   : > { %p1320_p13 = scmp.ge.s32.totalorder %s1793_s24, 8 }
  0x1a   : > { %173 = sbr.rel (%p1320_p13) target bundleno = 45 (0x2d), region = 28 }
  0x21   : > { %176 = sbr.rel (!%p1895_p4) target bundleno = 45 (0x2d), region = 32  ;;  %s178_s25 = sand.u32 (%p1895_p4), 1, %s1773_s19  }
  0x22   : > { %s1322_s6 = sshll.u32 (%p1895_p4), %s1884_s30, 3  ;;  %s1321_s9 = sshll.u32 (%p1895_p4), %s178_s25, 6 }
  0x23   : > { %s184_s5 = scalar_lea.vmem (%p1895_p4), %s2258_s0, %s1322_s6  ;;  %s180_s10 = scalar_lea.vmem (%p1895_p4), [#allocation7], %s1321_s9 }
  0x24   : > { %v226_v0 = vld [vmem:[%s184_s5] sm:$0xff] (%p1895_p4) }
  0x25   : > { %v228_v1 = vld [vmem:[%s184_s5 + $0x20] sm:$0xff] (%p1895_p4)  ;;  %227 = vst [vmem:[%s180_s10] sm:$0xff] (%p1895_p4), %v226_v0 }
  0x26   : > { %v230_v2 = vld [vmem:[%s184_s5 + $0x40] sm:$0xff] (%p1895_p4)  ;;  %229 = vst [vmem:[%s180_s10 + $0x8] sm:$0xff] (%p1895_p4), %v228_v1 }
  0x27   : > { %231 = vst [vmem:[%s180_s10 + $0x10] sm:$0xff] (%p1895_p4), %v230_v2  ;;  %v232_v3 = vld [vmem:[%s184_s5 + $0x60] sm:$0xff] (%p1895_p4) }
  0x28   : > { %v234_v4 = vld [vmem:[%s184_s5 + $0x80] sm:$0xff]  ;;  %233 = vst [vmem:[%s180_s10 + $0x18] sm:$0xff] %v232_v3 }
  0x29   : > { %v236_v5 = vld [vmem:[%s184_s5 + $0xa0] sm:$0xff]  ;;  %235 = vst [vmem:[%s180_s10 + $0x20] sm:$0xff] %v234_v4 }
  0x2a   : > { %237 = vst [vmem:[%s180_s10 + $0x28] sm:$0xff] %v236_v5  ;;  %v238_v6 = vld [vmem:[%s184_s5 + $0xc0] sm:$0xff] }
  0x2b   : > { %v240_v7 = vld [vmem:[%s184_s5 + $0xe0] sm:$0xff]  ;;  %239 = vst [vmem:[%s180_s10 + $0x30] sm:$0xff] %v238_v6 }
  0x2c   : > { %241 = vst [vmem:[%s180_s10 + $0x38] sm:$0xff] %v240_v7 }
  0x2d PF: > { %p1323_p0 = scmp.ge.s32.totalorder %s1793_s24, 1  ;;  %p246_p1 = scmp.lt.s32.totalorder %s1793_s24, 9 }
  0x2f   : > { %p247_p2 = pnand %p1323_p0, %p246_p1 }
  0x30   : > { %s253_s30 = sand.u32 (!%p247_p2), 1, %s1769_s18   ;;  %s2265_s7 = sand.u32 (!%p247_p2), 1, %s1761_s16  }
  0x31   : > { %250 = sbr.rel (%p247_p2) target bundleno = 1075 (0x433), region = 70  ;;  %s1324_s11 = sshll.u32 (!%p247_p2), %s253_s30, 6 }
  0x32   : > { %s1530_s13 = smul.u32 (!%p247_p2), 96, %s2265_s7  ;;  %s255_s14 = scalar_lea.vmem (!%p247_p2), [#allocation7], %s1324_s11 }
  0x33   : > { %p1325_p3 = scmp.ne.s32.totalorder (!%p247_p2), %s1781_s21, 0 }
  0x34   : > { %s1939_s25 = scalar_lea.vmem (!%p247_p2), [#allocation8], %s1530_s13 }
  0x38   : > { %284 = sbr.rel (%p1325_p3) target bundleno = 746 (0x2ea), region = 78  ;;  %v285_v8 = vld [vmem:[%s255_s14] sm:$0xff] (!%p1325_p3)  ;;  %s1326_s6 = sshll.u32 (!%p1325_p3), %s1777_s20, 6  ;;  %v286_v9 = vld [vmem:[%s255_s14 + $0x8] sm:$0xff] (!%p1325_p3)  ;;  %v287_v10 = vld [vmem:[%s255_s14 + $0x10] sm:$0xff] (!%p1325_p3) }
  0x39   : > { %v288_v11 = vld [vmem:[%s255_s14 + $0x18] sm:$0xff] (!%p1325_p3)  ;;  %v289_v12 = vld [vmem:[%s255_s14 + $0x20] sm:$0xff] (!%p1325_p3)  ;;  %v290_v13 = vld [vmem:[%s255_s14 + $0x28] sm:$0xff] (!%p1325_p3)  ;;  %s294_s9 = scalar_lea.vmem (!%p1325_p3), [#allocation2], %s1326_s6  ;;  %p1327_p4 = scmp.ne.s32.totalorder (!%p1325_p3), %s1777_s20, 0 }
  0x3a   : > { %295 = vst [vmem:[%s294_s9] sm:$0xff] (!%p1325_p3), %v285_v8  ;;  %296 = vst [vmem:[%s294_s9 + $0x8] sm:$0xff] (!%p1325_p3), %v286_v9  ;;  %v291_v14 = vld [vmem:[%s255_s14 + $0x30] sm:$0xff] (!%p1325_p3)  ;;  %v292_v15 = vld [vmem:[%s255_s14 + $0x38] sm:$0xff] (!%p1325_p3) }
  0x3b   : > { %297 = vst [vmem:[%s294_s9 + $0x10] sm:$0xff] (!%p1325_p3), %v287_v10  ;;  %298 = vst [vmem:[%s294_s9 + $0x18] sm:$0xff] (!%p1325_p3), %v288_v11 }
  0x3c   : > { %299 = vst [vmem:[%s294_s9 + $0x20] sm:$0xff] (!%p1325_p3), %v289_v12  ;;  %300 = vst [vmem:[%s294_s9 + $0x28] sm:$0xff] (!%p1325_p3), %v290_v13 }
  0x3d   : > { %301 = vst [vmem:[%s294_s9 + $0x30] sm:$0xff] (!%p1325_p3), %v291_v14  ;;  %302 = vst [vmem:[%s294_s9 + $0x38] sm:$0xff] (!%p1325_p3), %v292_v15 }
  0x3f   : > { %306 = sbr.rel (%p1327_p4) target bundleno = 72 (0x48), region = 82  ;;  %v1795_v16 = vmov (!%p1327_p4), 0.0  }
  0x40   : > { %307 = vst [vmem:[#allocation3] sm:$0xff] (!%p1327_p4), %v1795_v16  ;;  %308 = vst [vmem:[#allocation3 + $0x8] sm:$0xff] (!%p1327_p4), %v1795_v16 }
  0x41   : > { %309 = vst [vmem:[#allocation3 + $0x10] sm:$0xff] (!%p1327_p4), %v1795_v16  ;;  %310 = vst [vmem:[#allocation3 + $0x18] sm:$0xff] (!%p1327_p4), %v1795_v16 }
  0x42   : > { %311 = vst [vmem:[#allocation3 + $0x20] sm:$0xff] (!%p1327_p4), %v1795_v16  ;;  %312 = vst [vmem:[#allocation3 + $0x28] sm:$0xff] (!%p1327_p4), %v1795_v16 }
  0x43   : > { %313 = vst [vmem:[#allocation3 + $0x30] sm:$0xff] (!%p1327_p4), %v1795_v16  ;;  %314 = vst [vmem:[#allocation3 + $0x38] sm:$0xff] (!%p1327_p4), %v1795_v16 }
  0x44   : > { %315 = vst [vmem:[#allocation4] sm:$0xff] (!%p1327_p4), %v1795_v16  ;;  %316 = vst [vmem:[#allocation4 + $0x8] sm:$0xff] (!%p1327_p4), %v1795_v16 }
  0x45   : > { %317 = vst [vmem:[#allocation4 + $0x10] sm:$0xff] (!%p1327_p4), %v1795_v16  ;;  %318 = vst [vmem:[#allocation4 + $0x18] sm:$0xff] (!%p1327_p4), %v1795_v16 }
  0x46   : > { %319 = vst [vmem:[#allocation4 + $0x20] sm:$0xff] %v1795_v16  ;;  %320 = vst [vmem:[#allocation4 + $0x28] sm:$0xff] %v1795_v16 }
  0x47   : > { %321 = vst [vmem:[#allocation4 + $0x30] sm:$0xff] %v1795_v16  ;;  %322 = vst [vmem:[#allocation4 + $0x38] sm:$0xff] %v1795_v16 }
  0x48 PF: > { %v1482_v17 = vpack.c.bf16 %v286_v9, %v285_v8  ;;  %v1486_v18 = vpack.c.bf16 %v288_v11, %v287_v10  ;;  %v323_v19 = vld [vmem:[%s2259_s1] sm:$0xff]  ;;  %vm331_vm0 = vcmask 523264   ;;  %v1490_v21 = vpack.c.bf16 %v290_v13, %v289_v12  ;;  %v324_v23 = vld [vmem:[%s2259_s1 + $0x8] sm:$0xff]  ;;  %v325_v25 = vld [vmem:[%s2259_s1 + $0x10] sm:$0xff]  ;;  %p1336_p5 = scmp.ne.s32.totalorder %s1777_s20, 3 }
  0x49   : > { %v327_v20 = vld [vmem:[%s2259_s1 + $0x20] sm:$0xff]  ;;  %1430 = vmatprep.mubr.msk.f32.mxu0 %vm331_vm0, %v323_v19  ;;  %v1494_v22 = vpack.c.bf16 %v292_v15, %v291_v14  ;;  %v328_v24 = vld [vmem:[%s2259_s1 + $0x28] sm:$0xff]  ;;  %v329_v26 = vld [vmem:[%s2259_s1 + $0x30] sm:$0xff]  ;;  %vm633_vm1 = vcmask (!%p1336_p5), 7168   ;;  %s1796_s8 = smov (!%p1336_p5), 1   ;;  %s1797_s18 = smov (!%p1336_p5), 127  }
  0x4a   : > { %1483 = vmatprep.subr.bf16.mxu0 %v1482_v17  ;;  %1514 = vmatprep.subr.bf16.mxu1 %v1482_v17  ;;  %v326_v27 = vld [vmem:[%s2259_s1 + $0x18] sm:$0xff]  ;;  %v470_v29 = vld [vmem:[#allocation3 + $0x8] sm:$0xff]  ;;  %v469_v31 = vld [vmem:[#allocation3] sm:$0xff] }
  0x4b   : > { %1485 = vmatpush3.bf16.msra.mxu0 %v1482_v17  ;;  %1518 = vmatpush3.bf16.msra.mxu1 %v1482_v17  ;;  %v330_v28 = vld [vmem:[%s2259_s1 + $0x38] sm:$0xff]  ;;  %v474_v30 = vld [vmem:[#allocation3 + $0x28] sm:$0xff]  ;;  %v473_v32 = vld [vmem:[#allocation3 + $0x20] sm:$0xff] }
  0x4c   : > { %1487 = vmatprep.subr.bf16.mxu0 %v1486_v18  ;;  %1515 = vmatprep.subr.bf16.mxu1 %v1486_v18  ;;  %v472_v49 = vld [vmem:[#allocation3 + $0x18] sm:$0xff]  ;;  %v471_v53 = vld [vmem:[#allocation3 + $0x10] sm:$0xff] }
  0x4d   : > { %1436 = vmatprep.mubr.msk.f32.mxu1 %vm331_vm0, %v327_v20  ;;  %v494_v34 = vld [vmem:[#allocation4 + $0x8] sm:$0xff]  ;;  %v493_v42 = vld [vmem:[#allocation4] sm:$0xff]  ;;  %v476_v50 = vld [vmem:[#allocation3 + $0x38] sm:$0xff] }
  0x4e   : > { %v475_v54 = vld [vmem:[#allocation3 + $0x30] sm:$0xff]  ;;  %v496_v58 = vld [vmem:[#allocation4 + $0x18] sm:$0xff] }
  0x4f   : > { %1489 = vmatpush3.bf16.msra.mxu0 %v1486_v18  ;;  %1519 = vmatpush3.bf16.msra.mxu1 %v1486_v18  ;;  %v498_v36 = vld [vmem:[#allocation4 + $0x28] sm:$0xff]  ;;  %v497_v44 = vld [vmem:[#allocation4 + $0x20] sm:$0xff]  ;;  %v500_v60 = vld [vmem:[#allocation4 + $0x38] sm:$0xff] }
  0x50   : > { %1491 = vmatprep.subr.bf16.mxu0 %v1490_v21  ;;  %1516 = vmatprep.subr.bf16.mxu1 %v1490_v21  ;;  %v495_v2 = vld [vmem:[#allocation4 + $0x10] sm:$0xff] }
  0x51   : > { %v499_v4 = vld [vmem:[#allocation4 + $0x30] sm:$0xff] }
  0x53   : > { %1493 = vmatpush3.bf16.msra.mxu0 %v1490_v21  ;;  %1520 = vmatpush3.bf16.msra.mxu1 %v1490_v21 }
  0x54   : > { %1495 = vmatprep.subr.bf16.mxu0 %v1494_v22  ;;  %1517 = vmatprep.subr.bf16.mxu1 %v1494_v22 }
  0x57   : > { %1497 = vmatpush3.bf16.msra.mxu0 %v1494_v22  ;;  %1521 = vmatpush3.bf16.msra.mxu1 %v1494_v22 }
  0x5a   : > { %1431 = vmatmul.mubr.msk.f32.vlgmr.msra.gmra.mrb[0].mxu0 %vm331_vm0, %v324_v23  ;;  %1437 = vmatmul.mubr.msk.f32.vlgmr.msra.gmra.mrb[0].mxu1 %vm331_vm0, %v328_v24 }
  0x5b   : > { %1433 = vmatprep.mubr.msk.f32.mxu0 %vm331_vm0, %v325_v25  ;;  %1439 = vmatprep.mubr.msk.f32.mxu1 %vm331_vm0, %v329_v26 }
  0x5e   : > { %1434 = vmatmul.mubr.msk.f32.gmra.mrb[2].mxu0 %vm331_vm0, %v326_v27  ;;  %1440 = vmatmul.mubr.msk.f32.gmra.mrb[2].mxu1 %vm331_vm0, %v330_v28 }
 0x12d   : > { %v1432_v33 = vpop.f32.mrb[0].mxu0  ;;  %v1438_v35 = vpop.f32.mrb[0].mxu1 }
 0x12e   : > { %v462_v37 = vmul.f32 %v1432_v33, %v1432_v33  ;;  %v478_v38 = vadd.f32 %v1432_v33, %v470_v29  ;;  %v466_v39 = vmul.f32 %v1438_v35, %v1438_v35  ;;  %v482_v40 = vadd.f32 %v1438_v35, %v474_v30  ;;  %v422_v41 = vpop.f32.mrb[1].mxu0  ;;  %v442_v43 = vpop.f32.mrb[1].mxu1 }
 0x12f   : > { %v461_v45 = vmul.f32 %v422_v41, %v422_v41  ;;  %v477_v46 = vadd.f32 %v469_v31, %v422_v41  ;;  %v465_v47 = vmul.f32 %v442_v43, %v442_v43  ;;  %v481_v48 = vadd.f32 %v473_v32, %v442_v43 }
 0x130   : > { %486 = vst [vmem:[#allocation3 + $0x8] sm:$0xff] %v478_v38  ;;  %v502_v51 = vadd.f32 %v494_v34, %v462_v37  ;;  %490 = vst [vmem:[#allocation3 + $0x28] sm:$0xff] %v482_v40  ;;  %v506_v52 = vadd.f32 %v498_v36, %v466_v39 }
 0x131   : > { %485 = vst [vmem:[#allocation3] sm:$0xff] %v477_v46  ;;  %v501_v55 = vadd.f32 %v493_v42, %v461_v45  ;;  %489 = vst [vmem:[#allocation3 + $0x20] sm:$0xff] %v481_v48  ;;  %v505_v56 = vadd.f32 %v497_v44, %v465_v47  ;;  %v1435_v57 = vpop.f32.mrb[2].mxu0  ;;  %v1441_v59 = vpop.f32.mrb[2].mxu1 }
 0x132   : > { %510 = vst [vmem:[#allocation4 + $0x8] sm:$0xff] %v502_v51  ;;  %514 = vst [vmem:[#allocation4 + $0x28] sm:$0xff] %v506_v52  ;;  %v464_v61 = vmul.f32 %v1435_v57, %v1435_v57  ;;  %v480_v62 = vadd.f32 %v1435_v57, %v472_v49  ;;  %v468_v63 = vmul.f32 %v1441_v59, %v1441_v59  ;;  %v432_v1 = vpop.f32.mrb[3].mxu0  ;;  %v452_v3 = vpop.f32.mrb[3].mxu1  ;;  %520 = sbr.rel (%p1336_p5) target bundleno = 746 (0x2ea), region = 86 }
 0x133   : > { %v484_v0 = vadd.f32 %v1441_v59, %v476_v50  ;;  %509 = vst [vmem:[#allocation4] sm:$0xff] %v501_v55  ;;  %513 = vst [vmem:[#allocation4 + $0x20] sm:$0xff] %v505_v56  ;;  %v463_v5 = vmul.f32 %v432_v1, %v432_v1  ;;  %v479_v6 = vadd.f32 %v471_v53, %v432_v1 }
 0x134   : > { %v467_v7 = vmul.f32 %v452_v3, %v452_v3  ;;  %v483_v8 = vadd.f32 %v475_v54, %v452_v3  ;;  %488 = vst [vmem:[#allocation3 + $0x18] sm:$0xff] %v480_v62  ;;  %v504_v9 = vadd.f32 %v496_v58, %v464_v61  ;;  %v508_v10 = vadd.f32 %v500_v60, %v468_v63 }
 0x135   : > { %492 = vst [vmem:[#allocation3 + $0x38] sm:$0xff] %v484_v0  ;;  %487 = vst [vmem:[#allocation3 + $0x10] sm:$0xff] %v479_v6  ;;  %v503_v11 = vadd.f32 %v495_v2, %v463_v5 }
 0x136   : > { %491 = vst [vmem:[#allocation3 + $0x30] sm:$0xff] %v483_v8  ;;  %v507_v12 = vadd.f32 %v499_v4, %v467_v7  ;;  %512 = vst [vmem:[#allocation4 + $0x18] sm:$0xff] %v504_v9 }
 0x137   : > { %516 = vst [vmem:[#allocation4 + $0x38] sm:$0xff] %v508_v10  ;;  %511 = vst [vmem:[#allocation4 + $0x10] sm:$0xff] %v503_v11  ;;  %v522_v16 = vld [vmem:[#allocation3 + $0x8] sm:$0xff] (!%p1336_p5) }
 0x138   : > { %515 = vst [vmem:[#allocation4 + $0x30] sm:$0xff] %v507_v12  ;;  %v521_v14 = vld [vmem:[#allocation3] sm:$0xff] (!%p1336_p5)  ;;  %v526_v17 = vld [vmem:[#allocation3 + $0x28] sm:$0xff] (!%p1336_p5) }
 0x139   : > { %529 = vadd.xlane.f32.xlu0 %v521_v14  ;;  %v525_v18 = vld [vmem:[#allocation3 + $0x20] sm:$0xff]  ;;  %v546_v21 = vld [vmem:[#allocation4 + $0x8] sm:$0xff] }
 0x13a   : > { %v545_v22 = vld [vmem:[#allocation4] sm:$0xff]  ;;  %v550_v25 = vld [vmem:[#allocation4 + $0x28] sm:$0xff] }
 0x13b   : > { %v524_v15 = vld [vmem:[#allocation3 + $0x18] sm:$0xff]  ;;  %v549_v26 = vld [vmem:[#allocation4 + $0x20] sm:$0xff] }
 0x13c   : > { %v523_v13 = vld [vmem:[#allocation3 + $0x10] sm:$0xff]  ;;  %v528_v19 = vld [vmem:[#allocation3 + $0x38] sm:$0xff] }
 0x13d   : > { %533 = vadd.xlane.f32.xlu1 %v523_v13  ;;  %531 = vadd.xlane.f32.xlu0 %v522_v16  ;;  %v527_v20 = vld [vmem:[#allocation3 + $0x30] sm:$0xff]  ;;  %v548_v23 = vld [vmem:[#allocation4 + $0x18] sm:$0xff] }
 0x13e   : > { %v547_v24 = vld [vmem:[#allocation4 + $0x10] sm:$0xff]  ;;  %v552_v27 = vld [vmem:[#allocation4 + $0x38] sm:$0xff] }
 0x13f   : > { %v551_v28 = vld [vmem:[#allocation4 + $0x30] sm:$0xff] }
 0x141   : > { %535 = vadd.xlane.f32.xlu1 %v524_v15  ;;  %537 = vadd.xlane.f32.xlu0 %v525_v18 }
 0x145   : > { %539 = vadd.xlane.f32.xlu1 %v526_v17  ;;  %541 = vadd.xlane.f32.xlu0 %v527_v20  ;;  %v617_v20 = vld [vmem:[%s2260_s2] sm:$0xff] }
 0x149   : > { %543 = vadd.xlane.f32.xlu1 %v528_v19  ;;  %553 = vadd.xlane.f32.xlu0 %v545_v22  ;;  %v618_v19 = vld [vmem:[%s2260_s2 + $0x8] sm:$0xff] }
 0x14d   : > { %555 = vadd.xlane.f32.xlu1 %v546_v21  ;;  %557 = vadd.xlane.f32.xlu0 %v547_v24 }
 0x151   : > { %559 = vadd.xlane.f32.xlu1 %v548_v23  ;;  %561 = vadd.xlane.f32.xlu0 %v549_v26 }
 0x155   : > { %563 = vadd.xlane.f32.xlu1 %v550_v25  ;;  %565 = vadd.xlane.f32.xlu0 %v551_v28 }
 0x159   : > { %567 = vadd.xlane.f32.xlu1 %v552_v27  ;;  %v620_v27 = vld [vmem:[%s2260_s2 + $0x18] sm:$0xff] }
 0x1c6   : > { %v530_v30 = vpop.xlane.xlu0 %529 }
 0x1c7   : > { %v1977_v37 = vmul.f32 0.001953125, %v530_v30 }
 0x1c9   : > { %v585_v43 = vmul.f32 %v1977_v37, %v1977_v37 }
 0x1ca   : > { %v534_v29 = vpop.xlane.xlu1 %533  ;;  %v532_v32 = vpop.xlane.xlu0 %531 }
 0x1cb   : > { %v1979_v38 = vmul.f32 0.001953125, %v532_v32  ;;  %v1981_v39 = vmul.f32 0.001953125, %v534_v29  ;;  %v619_v29 = vld [vmem:[%s2260_s2 + $0x10] sm:$0xff] }
 0x1cd   : > { %v586_v44 = vmul.f32 %v1979_v38, %v1979_v38  ;;  %v587_v50 = vmul.f32 %v1981_v39, %v1981_v39 }
 0x1ce   : > { %v536_v31 = vpop.xlane.xlu1 %535  ;;  %v538_v34 = vpop.xlane.xlu0 %537 }
 0x1cf   : > { %v1983_v40 = vmul.f32 0.001953125, %v536_v31  ;;  %v1995_v52 = vmul.f32 0.001953125, %v538_v34 }
 0x1d1   : > { %v588_v51 = vmul.f32 %v1983_v40, %v1983_v40  ;;  %v589_v62 = vmul.f32 %v1995_v52, %v1995_v52 }
 0x1d2   : > { %v540_v33 = vpop.xlane.xlu1 %539  ;;  %v542_v36 = vpop.xlane.xlu0 %541 }
 0x1d3   : > { %v1989_v47 = vmul.f32 0.001953125, %v540_v33  ;;  %v2003_v0 = vmul.f32 0.001953125, %v542_v36  ;;  %v621_v36 = vld [vmem:[%s2260_s2 + $0x20] sm:$0xff] }
 0x1d5   : > { %v590_v59 = vmul.f32 %v1989_v47, %v1989_v47  ;;  %v591_v10 = vmul.f32 %v2003_v0, %v2003_v0 }
 0x1d6   : > { %v544_v35 = vpop.xlane.xlu1 %543  ;;  %v554_v42 = vpop.xlane.xlu0 %553 }
 0x1d7   : > { %v577_v46 = vmul.f32 0.001953125, %v554_v42  ;;  %v2001_v63 = vmul.f32 0.001953125, %v544_v35  ;;  %v622_v35 = vld [vmem:[%s2260_s2 + $0x28] sm:$0xff] }
 0x1d9   : > { %v593_v49 = vsub.f32 %v577_v46, %v585_v43  ;;  %v592_v9 = vmul.f32 %v2001_v63, %v2001_v63 }
 0x1da   : > { %v556_v41 = vpop.xlane.xlu1 %555  ;;  %v558_v54 = vpop.xlane.xlu0 %557 }
 0x1db   : > { %v578_v45 = vmul.f32 0.001953125, %v556_v41  ;;  %v601_v56 = vadd.f32 1e-05, %v593_v49  ;;  %v579_v58 = vmul.f32 0.001953125, %v558_v54 }
 0x1dd   : > { %v594_v48 = vsub.f32 %v578_v45, %v586_v44  ;;  %v595_v61 = vsub.f32 %v579_v58, %v587_v50  ;;  %v624_v44 = vld [vmem:[%s2260_s2 + $0x38] sm:$0xff]  ;;  %v623_v45 = vld [vmem:[%s2260_s2 + $0x30] sm:$0xff] }
 0x1de   : > { %v560_v53 = vpop.xlane.xlu1 %559  ;;  %v562_v2 = vpop.xlane.xlu0 %561 }
 0x1df   : > { %v602_v55 = vadd.f32 1e-05, %v594_v48  ;;  %v580_v57 = vmul.f32 0.001953125, %v560_v53  ;;  %v603_v4 = vadd.f32 1e-05, %v595_v61  ;;  %v581_v6 = vmul.f32 0.001953125, %v562_v2 }
 0x1e1   : > { %1625 = vrsqrt.f32 %v602_v55  ;;  %v596_v60 = vsub.f32 %v580_v57, %v588_v51  ;;  %v597_v8 = vsub.f32 %v581_v6, %v589_v62 }
 0x1e2   : > { %1627 = vrsqrt.f32 %v601_v56  ;;  %v564_v1 = vpop.xlane.xlu1 %563  ;;  %v566_v12 = vpop.xlane.xlu0 %565 }
 0x1e3   : > { %v604_v3 = vadd.f32 1e-05, %v596_v60  ;;  %v582_v5 = vmul.f32 0.001953125, %v564_v1  ;;  %v605_v14 = vadd.f32 1e-05, %v597_v8  ;;  %v583_v16 = vmul.f32 0.001953125, %v566_v12 }
 0x1e5   : > { %1629 = vrsqrt.f32 %v604_v3  ;;  %v598_v7 = vsub.f32 %v582_v5, %v590_v59  ;;  %v599_v18 = vsub.f32 %v583_v16, %v591_v10 }
 0x1e6   : > { %1631 = vrsqrt.f32 %v603_v4  ;;  %v568_v11 = vpop.xlane.xlu1 %567 }
 0x1e7   : > { %v606_v13 = vadd.f32 1e-05, %v598_v7  ;;  %v584_v15 = vmul.f32 0.001953125, %v568_v11  ;;  %v607_v23 = vadd.f32 1e-05, %v599_v18 }
 0x1e9   : > { %1633 = vrsqrt.f32 %v606_v13  ;;  %v600_v17 = vsub.f32 %v584_v15, %v592_v9 }
 0x1ea   : > { %1635 = vrsqrt.f32 %v605_v14 }
 0x1eb   : > { %v1626_v21 = vpop.eup %1625  ;;  %v608_v22 = vadd.f32 1e-05, %v600_v17 }
 0x1ec   : > { %v1628_v24 = vpop.eup %1627  ;;  %v626_v25 = vmul.f32 %v1626_v21, %v618_v19 }
 0x1ed   : > { %1637 = vrsqrt.f32 %v608_v22  ;;  %v625_v26 = vmul.f32 %v1628_v24, %v617_v20 }
 0x1ee   : > { %1639 = vrsqrt.f32 %v607_v23  ;;  %v643_v28 = vmul.f32 %v626_v25, %v1979_v38  ;;  %635 = vst.msk [vmem:[#allocation5 + $0x8] sm:$0xff] %vm633_vm1, %v626_v25 }
 0x1ef   : > { %v1630_v30 = vpop.eup %1629  ;;  %v642_v31 = vmul.f32 %v625_v26, %v1977_v37  ;;  %634 = vst.msk [vmem:[#allocation5] sm:$0xff] %vm633_vm1, %v625_v26 }
 0x1f0   : > { %v1632_v32 = vpop.eup %1631  ;;  %660 = vrot.lane.b32.xlu1 %v643_v28, %s1796_s8  ;;  %v628_v33 = vmul.f32 %v1630_v30, %v620_v27 }
 0x1f1   : > { %658 = vrot.lane.b32.xlu0 %v642_v31, %s1796_s8  ;;  %v627_v34 = vmul.f32 %v1632_v32, %v619_v29 }
 0x1f2   : > { %637 = vst.msk [vmem:[#allocation5 + $0x18] sm:$0xff] %vm633_vm1, %v628_v33 }
 0x1f3   : > { %v1634_v37 = vpop.eup %1633  ;;  %v644_v38 = vmul.f32 %v627_v34, %v1981_v39  ;;  %636 = vst.msk [vmem:[#allocation5 + $0x10] sm:$0xff] %vm633_vm1, %v627_v34  ;;  %v645_v39 = vmul.f32 %v628_v33, %v1983_v40 }
 0x1f4   : > { %v1636_v41 = vpop.eup %1635  ;;  %v630_v42 = vmul.f32 %v1634_v37, %v622_v35 }
 0x1f5   : > { %662 = vrot.lane.b32.xlu1 %v644_v38, %s1796_s8  ;;  %v629_v43 = vmul.f32 %v1636_v41, %v621_v36 }
 0x1f6   : > { %639 = vst.msk [vmem:[#allocation5 + $0x28] sm:$0xff] %vm633_vm1, %v630_v42  ;;  %v647_v53 = vmul.f32 %v630_v42, %v1989_v47 }
 0x1f7   : > { %v1638_v46 = vpop.eup %1637  ;;  %v646_v48 = vmul.f32 %v629_v43, %v1995_v52  ;;  %638 = vst.msk [vmem:[#allocation5 + $0x20] sm:$0xff] %vm633_vm1, %v629_v43 }
 0x1f8   : > { %v1640_v49 = vpop.eup %1639  ;;  %v632_v50 = vmul.f32 %v1638_v46, %v624_v44 }
 0x1f9   : > { %664 = vrot.lane.b32.xlu1 %v645_v39, %s1796_s8  ;;  %666 = vrot.lane.b32.xlu0 %v646_v48, %s1796_s8  ;;  %v631_v51 = vmul.f32 %v1640_v49, %v623_v45 }
 0x1fa   : > { %641 = vst.msk [vmem:[#allocation5 + $0x38] sm:$0xff] %vm633_vm1, %v632_v50  ;;  %v649_v40 = vmul.f32 %v632_v50, %v2001_v63 }
 0x1fb   : > { %v648_v54 = vmul.f32 %v631_v51, %v2003_v0  ;;  %640 = vst.msk [vmem:[#allocation5 + $0x30] sm:$0xff] %vm633_vm1, %v631_v51 }
 0x1fd   : > { %668 = vrot.lane.b32.xlu1 %v647_v53, %s1796_s8  ;;  %670 = vrot.lane.b32.xlu0 %v648_v54, %s1796_s8 }
 0x201   : > { %672 = vrot.lane.b32.xlu1 %v649_v40, %s1796_s8 }
 0x262   : > { %v661_v52 = vpop.permute.xlu1 %660 }
 0x263   : > { %v683_v55 = vsub.f32 %v618_v19, %v661_v52  ;;  %v659_v56 = vpop.permute.xlu0 %658 }
 0x264   : > { %v682_v57 = vsub.f32 %v617_v20, %v659_v56 }
 0x265   : > { %700 = vrot.lane.b32.xlu1 %v683_v55, %s1797_s18 }
 0x266   : > { %698 = vrot.lane.b32.xlu0 %v682_v57, %s1797_s18 }
 0x267   : > { %v663_v47 = vpop.permute.xlu1 %662 }
 0x268   : > { %v684_v58 = vsub.f32 %v619_v29, %v663_v47 }
 0x26a   : > { %702 = vrot.lane.b32.xlu0 %v684_v58, %s1797_s18 }
 0x26b   : > { %v665_v59 = vpop.permute.xlu1 %664  ;;  %v667_v60 = vpop.permute.xlu0 %666 }
 0x26c   : > { %v685_v61 = vsub.f32 %v620_v27, %v665_v59  ;;  %v686_v62 = vsub.f32 %v621_v36, %v667_v60 }
 0x26e   : > { %704 = vrot.lane.b32.xlu1 %v685_v61, %s1797_s18  ;;  %706 = vrot.lane.b32.xlu0 %v686_v62, %s1797_s18 }
 0x26f   : > { %v669_v0 = vpop.permute.xlu1 %668  ;;  %v671_v63 = vpop.permute.xlu0 %670 }
 0x270   : > { %v687_v1 = vsub.f32 %v622_v35, %v669_v0  ;;  %v688_v2 = vsub.f32 %v623_v45, %v671_v63 }
 0x272   : > { %708 = vrot.lane.b32.xlu1 %v687_v1, %s1797_s18  ;;  %710 = vrot.lane.b32.xlu0 %v688_v2, %s1797_s18 }
 0x273   : > { %v673_v3 = vpop.permute.xlu1 %672 }
 0x274   : > { %v689_v4 = vsub.f32 %v624_v44, %v673_v3 }
 0x276   : > { %712 = vrot.lane.b32.xlu1 %v689_v4, %s1797_s18 }
 0x2d7   : > { %v701_v5 = vpop.permute.xlu1 %700 }
 0x2d8   : > { %723 = vst.msk [vmem:[#allocation6 + $0x8] sm:$0xff] %vm633_vm1, %v701_v5  ;;  %v699_v6 = vpop.permute.xlu0 %698 }
 0x2d9   : > { %722 = vst.msk [vmem:[#allocation6] sm:$0xff] %vm633_vm1, %v699_v6 }
 0x2dc   : > { %v703_v7 = vpop.permute.xlu0 %702 }
 0x2dd   : > { %724 = vst.msk [vmem:[#allocation6 + $0x10] sm:$0xff] %vm633_vm1, %v703_v7 }
 0x2e0   : > { %v705_v8 = vpop.permute.xlu1 %704  ;;  %v707_v9 = vpop.permute.xlu0 %706 }
 0x2e1   : > { %725 = vst.msk [vmem:[#allocation6 + $0x18] sm:$0xff] %vm633_vm1, %v705_v8  ;;  %726 = vst.msk [vmem:[#allocation6 + $0x20] sm:$0xff] %vm633_vm1, %v707_v9 }
 0x2e4   : > { %v709_v10 = vpop.permute.xlu1 %708  ;;  %v711_v11 = vpop.permute.xlu0 %710 }
 0x2e5   : > { %727 = vst.msk [vmem:[#allocation6 + $0x28] sm:$0xff] %vm633_vm1, %v709_v10  ;;  %728 = vst.msk [vmem:[#allocation6 + $0x30] sm:$0xff] %vm633_vm1, %v711_v11 }
 0x2e8   : > { %v713_v12 = vpop.permute.xlu1 %712 }
 0x2e9   : > { %729 = vst.msk [vmem:[#allocation6 + $0x38] sm:$0xff] %vm633_vm1, %v713_v12 }
 0x2ea PF: > { %p1337_p6 = scmp.ne.s32.totalorder %s1781_s21, 1 }
 0x2eb   : > { %s1338_s26 = sshll.u32 (!%p1337_p6), %s1777_s20, 6  ;;  %v744_v13 = vld [vmem:[%s2259_s1] sm:$0xff] (!%p1337_p6)  ;;  %vm760_vm2 = vcmask (!%p1337_p6), 523264   ;;  %v1798_v18 = vmov (!%p1337_p6), 0   ;;  %v1068_v27 = vld [vmem:[%s2261_s3 + $0x10] sm:$0xff] (!%p1337_p6)  ;;  %v1069_v29 = vld [vmem:[%s2261_s3 + $0x18] sm:$0xff] (!%p1337_p6) }
 0x2ec   : > { %733 = sbr.rel (%p1337_p6) target bundleno = 1047 (0x417), region = 90  ;;  %v752_v14 = vld [vmem:[%s2259_s1 + $0x40] sm:$0xff] (!%p1337_p6)  ;;  %1458 = vmatprep.mubr.msk.f32.mxu0 (!%p1337_p6), %vm760_vm2, %v744_v13  ;;  %s735_s11 = scalar_lea.vmem (!%p1337_p6), [#allocation2], %s1338_s26  ;;  %1642 = vset.pattern.permute.xlu1 (!%p1337_p6), %v1798_v18  ;;  %v1067_v30 = vld [vmem:[%s2261_s3 + $0x8] sm:$0xff] (!%p1337_p6)  ;;  %v746_v36 = vld [vmem:[%s2259_s1 + $0x10] sm:$0xff] (!%p1337_p6) }
 0x2ed   : > { %1470 = vmatprep.mubr.msk.f32.mxu1 (!%p1337_p6), %vm760_vm2, %v752_v14  ;;  %1641 = vset.pattern.permute.xlu0 (!%p1337_p6), %v1798_v18  ;;  %v1066_v28 = vld [vmem:[%s2261_s3] sm:$0xff] (!%p1337_p6)  ;;  %v1119_v32 = vld [vmem:[%s2261_s3 + $0x28] sm:$0xff] (!%p1337_p6)  ;;  %v754_v37 = vld [vmem:[%s2259_s1 + $0x50] sm:$0xff] (!%p1337_p6) }
 0x2ee   : > { %1082 = vperm.xlu1 (!%p1337_p6), %1642, %v1068_v27   ;;  %1072 = vperm.xlu0 (!%p1337_p6), %1641, %v1066_v28   ;;  %v1118_v33 = vld [vmem:[%s2261_s3 + $0x20] sm:$0xff] (!%p1337_p6)  ;;  %v745_v34 = vld [vmem:[%s2259_s1 + $0x8] sm:$0xff] (!%p1337_p6)  ;;  %v1121_v38 = vld [vmem:[%s2261_s3 + $0x38] sm:$0xff] (!%p1337_p6) }
 0x2ef   : > { %v736_v15 = vld [vmem:[%s735_s11] sm:$0xff] (!%p1337_p6)  ;;  %v737_v16 = vld [vmem:[%s735_s11 + $0x8] sm:$0xff] (!%p1337_p6)  ;;  %v738_v17 = vld [vmem:[%s735_s11 + $0x10] sm:$0xff] (!%p1337_p6) }
 0x2f0   : > { %v1498_v19 = vpack.c.bf16 (!%p1337_p6), %v737_v16, %v736_v15  ;;  %1202 = vst [vmem:[%s1939_s25] sm:$0xff] (!%p1337_p6), %v736_v15  ;;  %1203 = vst [vmem:[%s1939_s25 + $0x8] sm:$0xff] (!%p1337_p6), %v737_v16  ;;  %v739_v20 = vld [vmem:[%s735_s11 + $0x18] sm:$0xff] (!%p1337_p6)  ;;  %v740_v21 = vld [vmem:[%s735_s11 + $0x20] sm:$0xff] (!%p1337_p6) }
 0x2f1   : > { %1204 = vst [vmem:[%s1939_s25 + $0x10] sm:$0xff] (!%p1337_p6), %v738_v17  ;;  %v741_v22 = vld [vmem:[%s735_s11 + $0x28] sm:$0xff] (!%p1337_p6)  ;;  %v1502_v23 = vpack.c.bf16 (!%p1337_p6), %v739_v20, %v738_v17  ;;  %1205 = vst [vmem:[%s1939_s25 + $0x18] sm:$0xff] (!%p1337_p6), %v739_v20  ;;  %v742_v24 = vld [vmem:[%s735_s11 + $0x30] sm:$0xff] (!%p1337_p6) }
 0x2f2   : > { %1363 = vst [vmem:[%s1939_s25 + $0x20] sm:$0xff] (!%p1337_p6), %v740_v21  ;;  %1364 = vst [vmem:[%s1939_s25 + $0x28] sm:$0xff] (!%p1337_p6), %v741_v22  ;;  %v743_v25 = vld [vmem:[%s735_s11 + $0x38] sm:$0xff] (!%p1337_p6)  ;;  %1499 = vmatprep.subr.bf16.mxu0 (!%p1337_p6), %v1498_v19  ;;  %1522 = vmatprep.subr.bf16.mxu1 (!%p1337_p6), %v1498_v19  ;;  %v1506_v26 = vpack.c.bf16 (!%p1337_p6), %v741_v22, %v740_v21  ;;  %v753_v35 = vld [vmem:[%s2259_s1 + $0x48] sm:$0xff] (!%p1337_p6) }
 0x2f3   : > { %1365 = vst [vmem:[%s1939_s25 + $0x30] sm:$0xff] %v742_v24  ;;  %1366 = vst [vmem:[%s1939_s25 + $0x38] sm:$0xff] %v743_v25  ;;  %1501 = vmatpush3.bf16.msra.mxu0 %v1498_v19  ;;  %1526 = vmatpush3.bf16.msra.mxu1 %v1498_v19  ;;  %v1510_v31 = vpack.c.bf16 %v743_v25, %v742_v24  ;;  %v1120_v41 = vld [vmem:[%s2261_s3 + $0x30] sm:$0xff]  ;;  %v747_v42 = vld [vmem:[%s2259_s1 + $0x18] sm:$0xff] }
 0x2f4   : > { %1503 = vmatprep.subr.bf16.mxu0 %v1502_v23  ;;  %1523 = vmatprep.subr.bf16.mxu1 %v1502_v23  ;;  %v755_v43 = vld [vmem:[%s2259_s1 + $0x58] sm:$0xff]  ;;  %v748_v44 = vld [vmem:[%s2259_s1 + $0x20] sm:$0xff]  ;;  %v955_v46 = vld [vmem:[#allocation5 + $0x8] sm:$0xff] }
 0x2f5   : > { %1087 = vperm.xlu1 %1642, %v1069_v29   ;;  %1077 = vperm.xlu0 %1641, %v1067_v30   ;;  %v756_v45 = vld [vmem:[%s2259_s1 + $0x60] sm:$0xff]  ;;  %v749_v48 = vld [vmem:[%s2259_s1 + $0x28] sm:$0xff]  ;;  %v750_v50 = vld [vmem:[%s2259_s1 + $0x30] sm:$0xff] }
 0x2f6   : > { %v954_v39 = vld [vmem:[#allocation5] sm:$0xff]  ;;  %v757_v49 = vld [vmem:[%s2259_s1 + $0x68] sm:$0xff]  ;;  %v758_v51 = vld [vmem:[%s2259_s1 + $0x70] sm:$0xff] }
 0x2f7   : > { %1505 = vmatpush3.bf16.msra.mxu0 %v1502_v23  ;;  %1527 = vmatpush3.bf16.msra.mxu1 %v1502_v23  ;;  %v957_v53 = vld [vmem:[#allocation5 + $0x18] sm:$0xff]  ;;  %v956_v54 = vld [vmem:[#allocation5 + $0x10] sm:$0xff]  ;;  %v959_v55 = vld [vmem:[#allocation5 + $0x28] sm:$0xff] }
 0x2f8   : > { %1507 = vmatprep.subr.bf16.mxu0 %v1506_v26  ;;  %1524 = vmatprep.subr.bf16.mxu1 %v1506_v26  ;;  %v751_v40 = vld [vmem:[%s2259_s1 + $0x38] sm:$0xff]  ;;  %v958_v56 = vld [vmem:[#allocation5 + $0x20] sm:$0xff]  ;;  %v960_v47 = vld [vmem:[#allocation5 + $0x30] sm:$0xff] }
 0x2f9   : > { %1129 = vperm.xlu1 %1642, %v1119_v32   ;;  %1124 = vperm.xlu0 %1641, %v1118_v33   ;;  %v759_v52 = vld [vmem:[%s2259_s1 + $0x78] sm:$0xff]  ;;  %v963_v58 = vld [vmem:[#allocation6 + $0x8] sm:$0xff]  ;;  %v962_v59 = vld [vmem:[#allocation6] sm:$0xff] }
 0x2fa   : > { %v961_v57 = vld [vmem:[#allocation5 + $0x38] sm:$0xff]  ;;  %v964_v61 = vld [vmem:[#allocation6 + $0x10] sm:$0xff]  ;;  %v967_v62 = vld [vmem:[#allocation6 + $0x28] sm:$0xff] }
 0x2fb   : > { %1509 = vmatpush3.bf16.msra.mxu0 %v1506_v26  ;;  %1528 = vmatpush3.bf16.msra.mxu1 %v1506_v26  ;;  %v965_v60 = vld [vmem:[#allocation6 + $0x18] sm:$0xff]  ;;  %v966_v0 = vld [vmem:[#allocation6 + $0x20] sm:$0xff]  ;;  %v968_v1 = vld [vmem:[#allocation6 + $0x30] sm:$0xff] }
 0x2fc   : > { %1511 = vmatprep.subr.bf16.mxu0 %v1510_v31  ;;  %1525 = vmatprep.subr.bf16.mxu1 %v1510_v31  ;;  %v969_v63 = vld [vmem:[#allocation6 + $0x38] sm:$0xff] }
 0x2fd   : > { %1139 = vperm.xlu1 %1642, %v1121_v38   ;;  %1134 = vperm.xlu0 %1641, %v1120_v41  }
 0x2ff   : > { %1513 = vmatpush3.bf16.msra.mxu0 %v1510_v31  ;;  %1529 = vmatpush3.bf16.msra.mxu1 %v1510_v31 }
 0x301   : > { %977 = vperm.xlu1 %1642, %v955_v46   ;;  %972 = vperm.xlu0 %1641, %v954_v39  }
 0x302   : > { %1459 = vmatmul.mubr.msk.f32.vlgmr.msra.gmra.mrb[0].mxu0 %vm760_vm2, %v745_v34  ;;  %1471 = vmatmul.mubr.msk.f32.vlgmr.msra.gmra.mrb[0].mxu1 %vm760_vm2, %v753_v35 }
 0x303   : > { %1461 = vmatprep.mubr.msk.f32.mxu0 %vm760_vm2, %v746_v36  ;;  %1473 = vmatprep.mubr.msk.f32.mxu1 %vm760_vm2, %v754_v37 }
 0x305   : > { %987 = vperm.xlu1 %1642, %v957_v53   ;;  %982 = vperm.xlu0 %1641, %v956_v54  }
 0x306   : > { %1462 = vmatmul.mubr.msk.f32.gmra.mrb[2].mxu0 %vm760_vm2, %v747_v42  ;;  %1474 = vmatmul.mubr.msk.f32.gmra.mrb[2].mxu1 %vm760_vm2, %v755_v43 }
 0x307   : > { %1464 = vmatprep.mubr.msk.f32.mxu0 %vm760_vm2, %v748_v44  ;;  %1476 = vmatprep.mubr.msk.f32.mxu1 %vm760_vm2, %v756_v45 }
 0x309   : > { %1025 = vperm.xlu1 %1642, %v959_v55   ;;  %1020 = vperm.xlu0 %1641, %v958_v56  }
 0x30a   : > { %1465 = vmatmul.mubr.msk.f32.gmra.mrb[4].mxu0 %vm760_vm2, %v749_v48  ;;  %1477 = vmatmul.mubr.msk.f32.gmra.mrb[4].mxu1 %vm760_vm2, %v757_v49 }
 0x30b   : > { %1467 = vmatprep.mubr.msk.f32.mxu0 %vm760_vm2, %v750_v50  ;;  %1479 = vmatprep.mubr.msk.f32.mxu1 %vm760_vm2, %v758_v51 }
 0x30d   : > { %1035 = vperm.xlu1 %1642, %v961_v57   ;;  %1030 = vperm.xlu0 %1641, %v960_v47  }
 0x30e   : > { %1468 = vmatmul.mubr.msk.f32.gmra.mrb[6].mxu0 %vm760_vm2, %v751_v40  ;;  %1480 = vmatmul.mubr.msk.f32.gmra.mrb[6].mxu1 %vm760_vm2, %v759_v52 }
 0x311   : > { %1001 = vperm.xlu1 %1642, %v963_v58   ;;  %996 = vperm.xlu0 %1641, %v962_v59  }
 0x315   : > { %1011 = vperm.xlu1 %1642, %v965_v60   ;;  %1006 = vperm.xlu0 %1641, %v964_v61  }
 0x319   : > { %1049 = vperm.xlu1 %1642, %v967_v62   ;;  %1044 = vperm.xlu0 %1641, %v966_v0  }
 0x31d   : > { %1059 = vperm.xlu1 %1642, %v969_v63   ;;  %1054 = vperm.xlu0 %1641, %v968_v1  }
 0x36d   : > { %v1083_v2 = vpop.permute.xlu1 %1082  ;;  %v1073_v3 = vpop.permute.xlu0 %1072 }
 0x374   : > { %v1088_v4 = vpop.permute.xlu1 %1087  ;;  %v1078_v5 = vpop.permute.xlu0 %1077 }
 0x378   : > { %v1130_v6 = vpop.permute.xlu1 %1129  ;;  %v1125_v7 = vpop.permute.xlu0 %1124 }
 0x37c   : > { %v1140_v8 = vpop.permute.xlu1 %1139  ;;  %v1135_v9 = vpop.permute.xlu0 %1134 }
 0x380   : > { %v978_v10 = vpop.permute.xlu1 %977  ;;  %v2163_v11 = vpop.permute.xlu0 %972 }
 0x384   : > { %v2165_v12 = vpop.permute.xlu1 %987  ;;  %v2167_v19 = vpop.permute.xlu0 %982 }
 0x388   : > { %v2169_v28 = vpop.permute.xlu1 %1025  ;;  %v1021_v37 = vpop.permute.xlu0 %1020 }
 0x38c   : > { %v1036_v39 = vpop.permute.xlu1 %1035  ;;  %v1031_v40 = vpop.permute.xlu0 %1030 }
 0x390   : > { %v1002_v57 = vpop.permute.xlu1 %1001  ;;  %v997_v60 = vpop.permute.xlu0 %996 }
 0x3d5   : > { %v1460_v13 = vpop.f32.mrb[0].mxu0  ;;  %v1472_v14 = vpop.f32.mrb[0].mxu1 }
 0x3d6   : > { %v1091_v15 = vadd.f32 %v1472_v14, %v1078_v5  ;;  %v875_v16 = vpop.f32.mrb[1].mxu0  ;;  %v915_v17 = vpop.f32.mrb[1].mxu1  ;;  %v991_v61 = vmul.f32 %v1460_v13, %v978_v10 }
 0x3d7   : > { %v1090_v18 = vadd.f32 %v1073_v3, %v915_v17  ;;  %v990_v0 = vmul.f32 %v2163_v11, %v875_v16  ;;  %v1007_v10 = vpop.permute.xlu0 %1006 }
 0x3d8   : > { %v1356_v20 = vmul.f32 -1.442695, %v1091_v15 }
 0x3d9   : > { %v1355_v21 = vmul.f32 -1.442695, %v1090_v18  ;;  %v1463_v22 = vpop.f32.mrb[2].mxu0  ;;  %v1475_v23 = vpop.f32.mrb[2].mxu1 }
 0x3da   : > { %1643 = vpow2.f32 %v1356_v20  ;;  %v1093_v24 = vadd.f32 %v1475_v23, %v1088_v4  ;;  %v885_v25 = vpop.f32.mrb[3].mxu0  ;;  %v925_v26 = vpop.f32.mrb[3].mxu1  ;;  %v1015_v4 = vadd.f32 %v1002_v57, %v991_v61  ;;  %v993_v5 = vmul.f32 %v1463_v22, %v2165_v12 }
 0x3db   : > { %1645 = vpow2.f32 %v1355_v21  ;;  %v1092_v27 = vadd.f32 %v1083_v2, %v925_v26  ;;  %v1012_v2 = vpop.permute.xlu1 %1011 }
 0x3dc   : > { %v1358_v29 = vmul.f32 -1.442695, %v1093_v24  ;;  %v1017_v11 = vadd.f32 %v1012_v2, %v993_v5 }
 0x3dd   : > { %v1357_v30 = vmul.f32 -1.442695, %v1092_v27  ;;  %v1466_v31 = vpop.f32.mrb[4].mxu0  ;;  %v1478_v32 = vpop.f32.mrb[4].mxu1 }
 0x3de   : > { %1647 = vpow2.f32 %v1358_v29  ;;  %v1143_v33 = vadd.f32 %v1478_v32, %v1130_v6  ;;  %v2171_v34 = vpop.f32.mrb[5].mxu0  ;;  %v935_v35 = vpop.f32.mrb[5].mxu1  ;;  %v1039_v16 = vmul.f32 %v1466_v31, %v2169_v28 }
 0x3df   : > { %1649 = vpow2.f32 %v1357_v30  ;;  %v1142_v36 = vadd.f32 %v1125_v7, %v935_v35  ;;  %v1014_v7 = vadd.f32 %v997_v60, %v990_v0  ;;  %v1050_v21 = vpop.permute.xlu1 %1049  ;;  %v1038_v12 = vmul.f32 %v1021_v37, %v2171_v34 }
 0x3e0   : > { %v1360_v38 = vmul.f32 -1.442695, %v1143_v33  ;;  %v1063_v26 = vadd.f32 %v1050_v21, %v1039_v16 }
 0x3e1   : > { %v1359_v41 = vmul.f32 -1.442695, %v1142_v36  ;;  %v2173_v42 = vpop.f32.mrb[6].mxu0  ;;  %v1481_v43 = vpop.f32.mrb[6].mxu1 }
 0x3e2   : > { %1651 = vpow2.f32 %v1360_v38  ;;  %v1145_v44 = vadd.f32 %v1481_v43, %v1140_v8  ;;  %v2175_v45 = vpop.f32.mrb[7].mxu0  ;;  %v945_v46 = vpop.f32.mrb[7].mxu1  ;;  %v992_v8 = vmul.f32 %v2167_v19, %v885_v25  ;;  %v1041_v27 = vmul.f32 %v2173_v42, %v1036_v39 }
 0x3e3   : > { %1653 = vpow2.f32 %v1359_v41  ;;  %v1144_v48 = vadd.f32 %v1135_v9, %v945_v46  ;;  %v1045_v25 = vpop.permute.xlu0 %1044  ;;  %v1060_v28 = vpop.permute.xlu1 %1059  ;;  %v1040_v38 = vmul.f32 %v1031_v40, %v2175_v45 }
 0x3e4   : > { %v1644_v49 = vpop.eup %1643  ;;  %v1362_v50 = vmul.f32 -1.442695, %v1145_v44  ;;  %v1016_v23 = vadd.f32 %v1007_v10, %v992_v8  ;;  %v1062_v30 = vadd.f32 %v1045_v25, %v1038_v12  ;;  %v1065_v34 = vadd.f32 %v1060_v28, %v1041_v27 }
 0x3e5   : > { %v1646_v51 = vpop.eup %1645  ;;  %v1107_v53 = vadd.f32 1.0, %v1644_v49  ;;  %v1361_v54 = vmul.f32 -1.442695, %v1144_v48 }
 0x3e6   : > { %v1106_v52 = vadd.f32 1.0, %v1646_v51  ;;  %1655 = vpow2.f32 %v1362_v50 }
 0x3e7   : > { %1657 = vrcp.f32 %v1107_v53  ;;  %v1055_v44 = vpop.permute.xlu0 %1054 }
 0x3e8   : > { %v1648_v55 = vpop.eup %1647  ;;  %1659 = vrcp.f32 %v1106_v52  ;;  %v1064_v42 = vadd.f32 %v1055_v44, %v1040_v38 }
 0x3e9   : > { %v1650_v56 = vpop.eup %1649  ;;  %v1109_v47 = vadd.f32 1.0, %v1648_v55  ;;  %1661 = vpow2.f32 %v1361_v54 }
 0x3ea   : > { %v1108_v58 = vadd.f32 1.0, %v1650_v56 }
 0x3eb   : > { %1663 = vrcp.f32 %v1109_v47 }
 0x3ec   : > { %v1652_v59 = vpop.eup %1651  ;;  %1665 = vrcp.f32 %v1108_v58 }
 0x3ed   : > { %v1654_v62 = vpop.eup %1653  ;;  %v1159_v63 = vadd.f32 1.0, %v1652_v59 }
 0x3ee   : > { %v1158_v1 = vadd.f32 1.0, %v1654_v62 }
 0x3ef   : > { %1667 = vrcp.f32 %v1159_v63 }
 0x3f0   : > { %v1656_v3 = vpop.eup %1655  ;;  %1669 = vrcp.f32 %v1158_v1 }
 0x3f1   : > { %v1658_v6 = vpop.eup %1657  ;;  %v1161_v9 = vadd.f32 1.0, %v1656_v3 }
 0x3f2   : > { %v1660_v14 = vpop.eup %1659  ;;  %v1171_v13 = vmul.f32 %v1658_v6, %v1015_v4 }
 0x3f3   : > { %v1662_v15 = vpop.eup %1661  ;;  %v1170_v17 = vmul.f32 %v1660_v14, %v1014_v7  ;;  %1671 = vrcp.f32 %v1161_v9 }
 0x3f4   : > { %v1160_v18 = vadd.f32 1.0, %v1662_v15 }
 0x3f5   : > { %v1664_v20 = vpop.eup %1663 }
 0x3f6   : > { %v1666_v22 = vpop.eup %1665  ;;  %v1173_v24 = vmul.f32 %v1664_v20, %v1017_v11  ;;  %1673 = vrcp.f32 %v1160_v18 }
 0x3f7   : > { %v1172_v19 = vmul.f32 %v1666_v22, %v1016_v23 }
 0x3f9   : > { %v1668_v29 = vpop.eup %1667 }
 0x3fa   : > { %v1670_v32 = vpop.eup %1669  ;;  %v1175_v33 = vmul.f32 %v1668_v29, %v1063_v26  ;;  %v1183_v35 = vadd.f32 %v1668_v29, %v1658_v6 }
 0x3fb   : > { %v1174_v31 = vmul.f32 %v1670_v32, %v1062_v30  ;;  %v1182_v36 = vadd.f32 %v1670_v32, %v1660_v14 }
 0x3fc   : > { %v1179_v41 = vadd.f32 %v1175_v33, %v1171_v13  ;;  %1675 = vrcp.f32 %v1183_v35 }
 0x3fd   : > { %v1672_v37 = vpop.eup %1671  ;;  %v1178_v43 = vadd.f32 %v1174_v31, %v1170_v17  ;;  %1677 = vrcp.f32 %v1182_v36 }
 0x3fe   : > { %v1177_v46 = vmul.f32 %v1672_v37, %v1065_v34  ;;  %v1185_v48 = vadd.f32 %v1672_v37, %v1664_v20 }
 0x400   : > { %v1674_v39 = vpop.eup %1673  ;;  %v1181_v49 = vadd.f32 %v1177_v46, %v1173_v24  ;;  %1679 = vrcp.f32 %v1185_v48 }
 0x401   : > { %v1176_v50 = vmul.f32 %v1674_v39, %v1064_v42  ;;  %v1184_v51 = vadd.f32 %v1674_v39, %v1666_v22 }
 0x403   : > { %v1180_v53 = vadd.f32 %v1176_v50, %v1172_v19  ;;  %1681 = vrcp.f32 %v1184_v51 }
 0x406   : > { %v1676_v54 = vpop.eup %1675 }
 0x407   : > { %v1678_v45 = vpop.eup %1677  ;;  %v1191_v40 = vmul.f32 %v1676_v54, %v1183_v35 }
 0x408   : > { %v1190_v52 = vmul.f32 %v1678_v45, %v1182_v36 }
 0x409   : > { %v1195_v55 = vsub.f32 2.0, %v1191_v40 }
 0x40a   : > { %v1680_v56 = vpop.eup %1679  ;;  %v1194_v57 = vsub.f32 2.0, %v1190_v52 }
 0x40b   : > { %v1199_v47 = vmul.f32 %v1676_v54, %v1195_v55  ;;  %v1193_v58 = vmul.f32 %v1680_v56, %v1185_v48 }
 0x40c   : > { %v1198_v59 = vmul.f32 %v1678_v45, %v1194_v57 }
 0x40d   : > { %v1682_v60 = vpop.eup %1681  ;;  %v1212_v61 = vmul.f32 %v1199_v47, %v1179_v41  ;;  %v1197_v62 = vsub.f32 2.0, %v1193_v58 }
 0x40e   : > { %v1211_v0 = vmul.f32 %v1198_v59, %v1178_v43  ;;  %v1192_v63 = vmul.f32 %v1682_v60, %v1184_v51 }
 0x40f   : > { %1368 = vst [vmem:[%s1939_s25 + $0x48] sm:$0xff] %v1212_v61  ;;  %v1201_v1 = vmul.f32 %v1680_v56, %v1197_v62 }
 0x410   : > { %1367 = vst [vmem:[%s1939_s25 + $0x40] sm:$0xff] %v1211_v0  ;;  %v1196_v2 = vsub.f32 2.0, %v1192_v63 }
 0x411   : > { %v1214_v3 = vmul.f32 %v1201_v1, %v1181_v49 }
 0x412   : > { %v1200_v4 = vmul.f32 %v1682_v60, %v1196_v2 }
 0x413   : > { %1370 = vst [vmem:[%s1939_s25 + $0x58] sm:$0xff] %v1214_v3 }
 0x414   : > { %v1213_v5 = vmul.f32 %v1200_v4, %v1180_v53 }
 0x416   : > { %1369 = vst [vmem:[%s1939_s25 + $0x50] sm:$0xff] %v1213_v5 }
 0x417 PF: > { %s1228_s10 = smul.u32 %s1777_s20, %s1781_s21  ;;  %s1234_s30 = sshll.u32 %s1939_s25, 4  ;;  %s2191_s30 = int_to_ptr.vmem [resolvable:$true] %s1234_s30 }
 0x418   : > { %s2271_s9 = sand.u32 1, %s1761_s16   ;;  %s1683_s26 = scalar_lea.vmem %s2191_s30, 1536 }
 0x419   : > { %s1371_s11 = sshll.u32 %s1228_s10, 7  ;;  %s2200_s18 = scalar_lea.sflag [#allocation9], %s2271_s9 }
 0x41a   : > { %s2196_s6 = scalar_lea.hbm %s2262_s4, %s1371_s11  ;;  %p1684_p8 = scmp.ne.s32.totalorder %s2191_s30, %s1683_s26 }
 0x41b   : > { %s1799_s20 = smov [#allocation8]  }
 0x41c   : > { %p1685_p9 = pnand %p1684_p8, %p1908_p7  ;;  %s1687_s21 = sshll.u32 %s1799_s20, 4  ;;  %s1688_s21 = int_to_ptr.vmem [resolvable:$false] %s1687_s21 }
 0x41d   : > { %s1689_s25 = scalar_lea.vmem %s1688_s21, 3072  ;;  %p1690_p11 = scmp.lt.s32.totalorder %s2191_s30, %s1688_s21 }
 0x41e   : > { %p1686_p10 = pneg %p1685_p9  ;;  %p1691_p13 = scmp.lt.s32.totalorder %s1689_s25, %s1683_s26 }
 0x420   : > { %p1692_p0 = por %p1691_p13, %p1690_p11 }
 0x422   : > { %p1693_p1 = pnand %p1692_p0, %p1686_p10 }
 0x424   : > { %1696 = shalt.err (!%p1693_p1)
}
 0x425   : > { %s1697_s8 = scalar_lea.hbm %s2196_s6, 1536  ;;  %s1701_s10 = scalar_lea.hbm %s2262_s4, 6144 }
 0x426   : > { %p1698_p2 = scmp.ne.s32.totalorder %s2196_s6, %s1697_s8  ;;  %p1702_p5 = scmp.lt.u32.totalorder %s2196_s6, %s2262_s4 }
 0x427   : > { %p1703_p6 = scmp.lt.u32.totalorder %s1701_s10, %s1697_s8  ;;  %p1705_p9 = scmp.lt.u32.totalorder %s1697_s8, %s2196_s6 }
 0x428   : > { %p1699_p3 = pnand %p1698_p2, %p1908_p7 }
 0x429   : > { %p1704_p8 = por %p1703_p6, %p1702_p5 }
 0x42a   : > { %p1700_p4 = pneg %p1699_p3 }
 0x42b   : > { %p1706_p10 = por %p1705_p9, %p1704_p8 }
 0x42d   : > { %p1707_p11 = pnand %p1706_p10, %p1700_p4 }
 0x42f   : > { %1710 = shalt.err (!%p1707_p11)
}
 0x430   : > { %s1800_s14 = smov 128   ;;  %s1801_s9 = smov 512  }
 0x431   : > { %s1802_s26 = smov 8  }
 0x432   : > { %1531 = dma.vmem_to_hbm [thread:$0]  (%p1908_p7), %s2191_s30, 1536, %s2196_s6, %s2200_s18, %s1800_s14, %s1801_s9, %s1802_s26  }
 0x433 PF: > { %p1537_p13 = scmp.ge.s32.totalorder %s1793_s24, 2  ;;  %s1249_s20 = sand.u32 1, %s1757_s15  }
 0x434   : > { %s1250_s21 = scalar_lea.sflag [#allocation9], %s1249_s20 }
 0x435   : > { %p1534_p0 = pnand %p1537_p13, %p1921_p12 }
 0x437   : > { %1752 = dma.done.wait (!%p1534_p0), %s1250_s21, 1536  }
 0x438   : > { %1754 = vsyncadd (!%p1534_p0), %s1250_s21, 4294965760  ;;  %s17_s24 = sadd.s32 1, %s1793_s24   ;;  %s2272_s20 = sld [smem:[#allocation11_spill]] }
 0x439   : > { %p14_p1 = scmp.ge.s32.totalorder %s17_s24, 10   ;;  %s2273_s21 = sld [smem:[#allocation12_spill]] }
 0x43a   : > { %s2274_s15 = smov %s1761_s16  ;;  %s2275_s16 = smov %s1765_s17 }
 0x43b   : > { %s2276_s17 = smov %s1916_s29  ;;  %s2277_s18 = smov %s1773_s19 }
 0x43c   : > { %s2278_s19 = smov %s1919_s23  ;;  %s2279_s22 = smov %s2282_s27 }
 0x43d   : > { %s2280_s23 = smov %s2286_s28  ;;  %16 = sbr.rel (!%p14_p1) target bundleno = 6 (0x6), region = 134 }
 0x444   :  { %1255 = vsyncpa [#allocation9], 1 }
 0x445   :  { %1257 = vsyncpa [#allocation9 + $0x1], 1 }

</bundles_post_ra>
